<compile_context>
chip_gen: v7x
topology: tpu7x:2x2x1
jax: 0.10.0
libtpu: 0.0.40
codegen_flags: <defaults>
</compile_context>

<pallas_src>
import functools

import jax
import jax.numpy as jnp
from jax import lax
from jax.experimental import pallas as pl
from jax.experimental.pallas import tpu as pltpu


def _channel_attention_kernel(w1t_ref, w2_ref, x_ref, o_ref, sum_ref, max_ref,
                              *, inv_hw, hw, thw, mask_tail):
    # w1t_ref : VMEM (C, hidden)   fc1 weight, transposed (resident across grid)
    # w2_ref  : VMEM (C, hidden)   fc2 weight             (resident across grid)
    # x_ref   : VMEM (TN, C, thw)  lane-dense spatial tile of TN samples
    # o_ref   : VMEM (TN, C, 1)    sigmoid(channel attention), written on last tile
    # sum_ref : VMEM (TN, C, 1) f32  running spatial sum
    # max_ref : VMEM (TN, C, 1) f32  running spatial max
    t = pl.program_id(1)

    @pl.when(t == 0)
    def _init():
        sum_ref[...] = jnp.zeros_like(sum_ref)
        max_ref[...] = jnp.full_like(max_ref, -jnp.inf)

    xb = x_ref[...]                                      # (TN, C, thw) native dtype
    if mask_tail:
        # Ragged tail tile: lanes past HW hold undefined padding -> mask them.
        lane = lax.broadcasted_iota(jnp.int32, xb.shape, 2)
        valid = (t * thw + lane) < hw
        x_sum = jnp.where(valid, xb, jnp.zeros_like(xb))
        x_max = jnp.where(valid, xb, jnp.full_like(xb, -jnp.inf))
    else:
        x_sum = xb
        x_max = xb

    # Sum accumulates in f32 (widen fused into the reduce); max is exact in the
    # native dtype and only the (TN, C, 1) result is widened.
    sum_ref[...] += jnp.sum(x_sum, axis=2, keepdims=True, dtype=jnp.float32)
    max_ref[...] = jnp.maximum(
        max_ref[...],
        jnp.max(x_max, axis=2, keepdims=True).astype(jnp.float32))

    @pl.when(t == pl.num_programs(1) - 1)
    def _finalize():
        avg = sum_ref[...] * inv_hw                      # (TN, C, 1)
        mx = max_ref[...]                                # (TN, C, 1)
        w1t = w1t_ref[...].astype(jnp.float32)[None]     # (1, C, hidden)
        w2 = w2_ref[...].astype(jnp.float32)[None]       # (1, C, hidden)
        # fc1 + ReLU (exact f32 on the VPU; the MLP is noise vs. the streaming).
        h_avg = jnp.maximum(jnp.sum(w1t * avg, axis=1, keepdims=True), 0.0)
        h_max = jnp.maximum(jnp.sum(w1t * mx, axis=1, keepdims=True), 0.0)
        h = h_avg + h_max                                # (TN, 1, hidden); fc2 linear
        y = jnp.sum(w2 * h, axis=2, keepdims=True)       # (TN, C, 1)  fc2
        o_ref[...] = jax.nn.sigmoid(y).astype(o_ref.dtype)


def _vmem_capacity_bytes():
    """Physical VMEM of the current TPU generation (fallback: 128 MiB)."""
    try:
        info = pltpu.get_tpu_info()
        for attr in ("vmem_capacity_bytes", "vmem_size_bytes", "vmem_bytes"):
            cap = getattr(info, attr, None)
            if cap:
                return int(cap)
    except Exception:
        pass
    return 128 * 1024 * 1024


def _choose_tiling(n, c, hw, itemsize):
    """Pick (TN, thw) so each grid step streams a multi-MiB lane-dense block."""
    cap = _vmem_capacity_bytes()
    if cap <= 64 * 1024 * 1024:
        # v7x: ~3.2 TB/s HBM needs bigger steps, but only 64 MiB VMEM -> ~10 MiB
        # per block (2 buffers => ~20 MiB), well under a ~48 MiB total cap.
        block_budget = 10 * 1024 * 1024
    else:
        # v5e / v6e (128 MiB physical): 8 MiB per block saturates the roofline
        # on v6e and stays inside the safe 4-8 MiB range for v5e.
        block_budget = 8 * 1024 * 1024

    bytes_per_sample = c * hw * itemsize
    if bytes_per_sample <= block_budget:
        thw = hw                                        # full spatial extent
        tn = max(1, min(n, block_budget // max(1, bytes_per_sample)))
    else:
        tn = 1
        max_thw = (block_budget // max(1, c * itemsize)) // 128 * 128
        max_thw = max(128, max_thw)
        thw = hw if max_thw >= hw else max_thw          # 128-multiple if < hw

    n_t = pl.cdiv(hw, thw)
    mask_tail = (hw % thw) != 0
    block_bytes = tn * c * thw * itemsize
    return tn, thw, n_t, mask_tail, block_bytes, cap


def channel_attention(x, fc1_weight, fc2_weight):
    """x: (N, C, H, W); fc1_weight: (hidden, C, 1, 1); fc2_weight: (C, hidden, 1, 1).

    Returns sigmoid channel attention of shape (N, C, 1, 1), matching PyTorch.
    """
    N, C, H, W = x.shape
    hidden = fc1_weight.shape[0]
    HW = H * W

    x2 = x.reshape(N, C, HW)                                    # free, lane-dense
    w1t = fc1_weight.reshape(hidden, C).T.astype(jnp.float32)   # (C, hidden)
    w2 = fc2_weight.reshape(C, hidden).astype(jnp.float32)      # (C, hidden)

    tn, thw, n_t, mask_tail, block_bytes, vmem_cap = _choose_tiling(
        N, C, HW, x2.dtype.itemsize)
    n_b = pl.cdiv(N, tn)

    # Explicit scoped-VMEM limit: double-buffered x block + (double-buffered)
    # weights + scratch/output + margin, capped at 3/4 of physical VMEM.
    weight_bytes = 2 * (2 * C * hidden * 4)
    scratch_bytes = 2 * tn * C * 4
    out_bytes = 2 * tn * C * x.dtype.itemsize
    needed = 2 * block_bytes + weight_bytes + scratch_bytes + out_bytes
    vmem_limit = int(min(max(needed + (8 << 20), 32 << 20), (vmem_cap * 3) // 4))

    kernel = functools.partial(
        _channel_attention_kernel,
        inv_hw=1.0 / HW, hw=HW, thw=thw, mask_tail=mask_tail)

    # TODO(synk): on v7x with N == 1 both TensorCores only get work if the
    # spatial axis is split per-core with a partial (sum, max) combine step;
    # not implemented here (no-op on v5e/v6e, and N >= 2 already shards on the
    # "parallel" batch axis).
    out = pl.pallas_call(
        kernel,
        out_shape=jax.ShapeDtypeStruct((N, C, 1), x.dtype),
        grid_spec=pltpu.PrefetchScalarGridSpec(
            num_scalar_prefetch=0,
            grid=(n_b, n_t),
            in_specs=[
                pl.BlockSpec((C, hidden), lambda n, t: (0, 0)),      # fc1^T (resident)
                pl.BlockSpec((C, hidden), lambda n, t: (0, 0)),      # fc2   (resident)
                pl.BlockSpec((tn, C, thw), lambda n, t: (n, 0, t)),  # x block
            ],
            out_specs=pl.BlockSpec((tn, C, 1), lambda n, t: (n, 0, 0)),
            scratch_shapes=[
                pltpu.VMEM((tn, C, 1), jnp.float32),   # running spatial sum
                pltpu.VMEM((tn, C, 1), jnp.float32),   # running spatial max
            ],
        ),
        compiler_params=pltpu.CompilerParams(
            dimension_semantics=("parallel", "arbitrary"),
            vmem_limit_bytes=vmem_limit,
        ),
        cost_estimate=pl.CostEstimate(
            flops=int(2 * N * C * HW + 6 * N * C * hidden),
            transcendentals=int(N * C),
            bytes_accessed=int(N * C * HW * x2.dtype.itemsize
                               + 2 * C * hidden * 4
                               + N * C * x.dtype.itemsize),
        ),
    )(w1t, w2, x2)

    return out.reshape(N, C, 1, 1)


def channel_attention_ref(x, fc1_weight, fc2_weight):
    """Pure-JAX reference matching the PyTorch ChannelAttention module."""
    N, C, H, W = x.shape
    hidden = fc1_weight.shape[0]
    w1 = fc1_weight.reshape(hidden, C)
    w2 = fc2_weight.reshape(C, hidden)
    avg = jnp.mean(x, axis=(2, 3))    # (N, C)
    mx = jnp.max(x, axis=(2, 3))      # (N, C)

    def mlp(v):
        h = jnp.maximum(
            jnp.einsum("nc,hc->nh", v, w1, precision=jax.lax.Precision.HIGHEST),
            0.0)
        return jnp.einsum("nh,ch->nc", h, w2, precision=jax.lax.Precision.HIGHEST)

    out = jax.nn.sigmoid(mlp(avg) + mlp(mx))
    return out.reshape(N, C, 1, 1)


if __name__ == "__main__":
    key = jax.random.PRNGKey(0)
    kx, k1, k2 = jax.random.split(key, 3)

    # Small shapes consistent with the module: in_planes=80, ratio=10 -> hidden=8.
    N, C, H, W = 2, 80, 16, 16
    ratio = 10
    hidden = C // ratio

    x = jax.random.normal(kx, (N, C, H, W), dtype=jnp.float32)
    fc1_w = 0.1 * jax.random.normal(k1, (hidden, C, 1, 1), dtype=jnp.float32)
    fc2_w = 0.1 * jax.random.normal(k2, (C, hidden, 1, 1), dtype=jnp.float32)

    out = channel_attention(x, fc1_w, fc2_w)
    out = jax.block_until_ready(out)

    ref = channel_attention_ref(x, fc1_w, fc2_w)
    assert out.shape == (N, C, 1, 1)
    assert jnp.allclose(out, ref, atol=1e-4, rtol=1e-4), "mismatch vs reference"

    print("KERNEL_OK")
</pallas_src>

<mosaic_0001>
module attributes {stable_mosaic.version = 11 : i64} {
  func.func @_channel_attention_kernel(%arg0: i32, %arg1: i32, %arg2: memref<80x8xf32, #tpu.memory_space<vmem>>, %arg3: memref<80x8xf32, #tpu.memory_space<vmem>>, %arg4: memref<2x80x256xf32, #tpu.memory_space<vmem>>, %arg5: memref<2x80x1xf32, #tpu.memory_space<vmem>>, %arg6: memref<2x80x1xf32, #tpu.memory_space<vmem>>, %arg7: memref<2x80x1xf32, #tpu.memory_space<vmem>>) attributes {dimension_semantics = [#tpu.dimension_semantics<parallel>, #tpu.dimension_semantics<arbitrary>], iteration_bounds = array<i64: 1, 1>, scalar_prefetch = 0 : i64, scratch_operands = 2 : i64, tpu.core_type = #tpu.core_type<tc>, window_params = [{pipeline_mode = #tpu.pipeline_mode<synchronous>, transform_indices = @transform_0, window_bounds = array<i64: 80, 8>}, {pipeline_mode = #tpu.pipeline_mode<synchronous>, transform_indices = @transform_1, window_bounds = array<i64: 80, 8>}, {transform_indices = @transform_2, window_bounds = array<i64: 2, 80, 256>}, {transform_indices = @transform_3, window_bounds = array<i64: 2, 80, 1>}]} {
    %c0_i32 = arith.constant 0 : i32
    %0 = arith.cmpi eq, %arg1, %c0_i32 : i32
    %1 = arith.extui %0 : i1 to i32
    %c0_i32_0 = arith.constant 0 : i32
    %2 = arith.cmpi ne, %1, %c0_i32_0 : i32
    scf.if %2 {
      %cst_18 = arith.constant 0.000000e+00 : f32
      %17 = vector.broadcast %cst_18 : f32 to vector<2x80x1xf32>
      %c0_19 = arith.constant 0 : index
      %c0_20 = arith.constant 0 : index
      %c0_21 = arith.constant 0 : index
      %18 = vector.load %arg6[%c0_19, %c0_20, %c0_21] : memref<2x80x1xf32, #tpu.memory_space<vmem>>, vector<2x80x1xf32>
      tpu.vector_store %arg6[%c0_19, %c0_20, %c0_21], %17 {strides = array<i32>} : memref<2x80x1xf32, #tpu.memory_space<vmem>>, vector<2x80x1xf32>,
      %cst_22 = arith.constant 0xFF800000 : f32
      %19 = vector.broadcast %cst_22 : f32 to vector<2x80x1xf32>
      %c0_23 = arith.constant 0 : index
      %c0_24 = arith.constant 0 : index
      %c0_25 = arith.constant 0 : index
      %20 = vector.load %arg7[%c0_23, %c0_24, %c0_25] : memref<2x80x1xf32, #tpu.memory_space<vmem>>, vector<2x80x1xf32>
      tpu.vector_store %arg7[%c0_23, %c0_24, %c0_25], %19 {strides = array<i32>} : memref<2x80x1xf32, #tpu.memory_space<vmem>>, vector<2x80x1xf32>,
    } else {
    }
    %c0 = arith.constant 0 : index
    %c0_1 = arith.constant 0 : index
    %c0_2 = arith.constant 0 : index
    %3 = vector.load %arg4[%c0, %c0_1, %c0_2] : memref<2x80x256xf32, #tpu.memory_space<vmem>>, vector<2x80x256xf32>
    %c0_3 = arith.constant 0 : index
    %c0_4 = arith.constant 0 : index
    %c0_5 = arith.constant 0 : index
    %4 = vector.load %arg6[%c0_3, %c0_4, %c0_5] : memref<2x80x1xf32, #tpu.memory_space<vmem>>, vector<2x80x1xf32>
    %cst = arith.constant dense<0.000000e+00> : vector<2x80xf32>
    %5 = vector.multi_reduction <add>, %3, %cst [2] : vector<2x80x256xf32> to vector<2x80xf32>
    %6 = vector.shape_cast %5 : vector<2x80xf32> to vector<2x80x1xf32>
    %7 = arith.addf %4, %6 : vector<2x80x1xf32>
    %c0_6 = arith.constant 0 : index
    %c0_7 = arith.constant 0 : index
    %c0_8 = arith.constant 0 : index
    %8 = vector.load %arg6[%c0_6, %c0_7, %c0_8] : memref<2x80x1xf32, #tpu.memory_space<vmem>>, vector<2x80x1xf32>
    tpu.vector_store %arg6[%c0_6, %c0_7, %c0_8], %7 {strides = array<i32>} : memref<2x80x1xf32, #tpu.memory_space<vmem>>, vector<2x80x1xf32>,
    %c0_9 = arith.constant 0 : index
    %c0_10 = arith.constant 0 : index
    %c0_11 = arith.constant 0 : index
    %9 = vector.load %arg7[%c0_9, %c0_10, %c0_11] : memref<2x80x1xf32, #tpu.memory_space<vmem>>, vector<2x80x1xf32>
    %cst_12 = arith.constant dense<0xFF800000> : vector<2x80xf32>
    %10 = vector.multi_reduction <maximumf>, %3, %cst_12 [2] : vector<2x80x256xf32> to vector<2x80xf32>
    %11 = vector.shape_cast %10 : vector<2x80xf32> to vector<2x80x1xf32>
    %12 = arith.maximumf %9, %11 : vector<2x80x1xf32>
    %c0_13 = arith.constant 0 : index
    %c0_14 = arith.constant 0 : index
    %c0_15 = arith.constant 0 : index
    %13 = vector.load %arg7[%c0_13, %c0_14, %c0_15] : memref<2x80x1xf32, #tpu.memory_space<vmem>>, vector<2x80x1xf32>
    tpu.vector_store %arg7[%c0_13, %c0_14, %c0_15], %12 {strides = array<i32>} : memref<2x80x1xf32, #tpu.memory_space<vmem>>, vector<2x80x1xf32>,
    %c0_i32_16 = arith.constant 0 : i32
    %14 = arith.cmpi eq, %arg1, %c0_i32_16 : i32
    %15 = arith.extui %14 : i1 to i32
    %c0_i32_17 = arith.constant 0 : i32
    %16 = arith.cmpi ne, %15, %c0_i32_17 : i32
    scf.if %16 {
      %c0_18 = arith.constant 0 : index
      %c0_19 = arith.constant 0 : index
      %c0_20 = arith.constant 0 : index
      %17 = vector.load %arg6[%c0_18, %c0_19, %c0_20] : memref<2x80x1xf32, #tpu.memory_space<vmem>>, vector<2x80x1xf32>
      %cst_21 = arith.constant 3.906250e-03 : f32
      %18 = vector.broadcast %cst_21 : f32 to vector<2x80x1xf32>
      %19 = arith.mulf %17, %18 : vector<2x80x1xf32>
      %c0_22 = arith.constant 0 : index
      %c0_23 = arith.constant 0 : index
      %c0_24 = arith.constant 0 : index
      %20 = vector.load %arg7[%c0_22, %c0_23, %c0_24] : memref<2x80x1xf32, #tpu.memory_space<vmem>>, vector<2x80x1xf32>
      %c0_25 = arith.constant 0 : index
      %c0_26 = arith.constant 0 : index
      %21 = vector.load %arg2[%c0_25, %c0_26] : memref<80x8xf32, #tpu.memory_space<vmem>>, vector<80x8xf32>
      %22 = vector.shape_cast %21 : vector<80x8xf32> to vector<1x80x8xf32>
      %c0_27 = arith.constant 0 : index
      %c0_28 = arith.constant 0 : index
      %23 = vector.load %arg3[%c0_27, %c0_28] : memref<80x8xf32, #tpu.memory_space<vmem>>, vector<80x8xf32>
      %24 = vector.shape_cast %23 : vector<80x8xf32> to vector<1x80x8xf32>
      %25 = vector.broadcast %22 : vector<1x80x8xf32> to vector<2x80x8xf32>
      %26 = vector.broadcast %19 : vector<2x80x1xf32> to vector<2x80x8xf32>
      %27 = arith.mulf %25, %26 : vector<2x80x8xf32>
      %cst_29 = arith.constant dense<0.000000e+00> : vector<2x8xf32>
      %28 = vector.multi_reduction <add>, %27, %cst_29 [1] : vector<2x80x8xf32> to vector<2x8xf32>
      %29 = vector.shape_cast %28 : vector<2x8xf32> to vector<2x1x8xf32>
      %cst_30 = arith.constant 0.000000e+00 : f32
      %30 = vector.broadcast %cst_30 : f32 to vector<2x1x8xf32>
      %31 = arith.maximumf %29, %30 : vector<2x1x8xf32>
      %32 = vector.broadcast %22 : vector<1x80x8xf32> to vector<2x80x8xf32>
      %33 = vector.broadcast %20 : vector<2x80x1xf32> to vector<2x80x8xf32>
      %34 = arith.mulf %32, %33 : vector<2x80x8xf32>
      %cst_31 = arith.constant dense<0.000000e+00> : vector<2x8xf32>
      %35 = vector.multi_reduction <add>, %34, %cst_31 [1] : vector<2x80x8xf32> to vector<2x8xf32>
      %36 = vector.shape_cast %35 : vector<2x8xf32> to vector<2x1x8xf32>
      %cst_32 = arith.constant 0.000000e+00 : f32
      %37 = vector.broadcast %cst_32 : f32 to vector<2x1x8xf32>
      %38 = arith.maximumf %36, %37 : vector<2x1x8xf32>
      %39 = arith.addf %31, %38 : vector<2x1x8xf32>
      %40 = vector.broadcast %24 : vector<1x80x8xf32> to vector<2x80x8xf32>
      %41 = vector.broadcast %39 : vector<2x1x8xf32> to vector<2x80x8xf32>
      %42 = arith.mulf %40, %41 : vector<2x80x8xf32>
      %cst_33 = arith.constant dense<0.000000e+00> : vector<2x80xf32>
      %43 = vector.multi_reduction <add>, %42, %cst_33 [2] : vector<2x80x8xf32> to vector<2x80xf32>
      %44 = vector.shape_cast %43 : vector<2x80xf32> to vector<2x80x1xf32>
      %45 = arith.negf %44 : vector<2x80x1xf32>
      %46 = math.exp %45 : vector<2x80x1xf32>
      %cst_34 = arith.constant 1.000000e+00 : f32
      %47 = vector.broadcast %cst_34 : f32 to vector<2x80x1xf32>
      %48 = arith.addf %47, %46 : vector<2x80x1xf32>
      %49 = arith.divf %47, %48 : vector<2x80x1xf32>
      %c0_35 = arith.constant 0 : index
      %c0_36 = arith.constant 0 : index
      %c0_37 = arith.constant 0 : index
      %50 = vector.load %arg5[%c0_35, %c0_36, %c0_37] : memref<2x80x1xf32, #tpu.memory_space<vmem>>, vector<2x80x1xf32>
      tpu.vector_store %arg5[%c0_35, %c0_36, %c0_37], %49 {strides = array<i32>} : memref<2x80x1xf32, #tpu.memory_space<vmem>>, vector<2x80x1xf32>,
    } else {
    }
    return
  }
  func.func @transform_0(%arg0: i32, %arg1: i32) -> (i32, i32) {
    %c0_i32 = arith.constant 0 : i32
    %c0_i32_0 = arith.constant 0 : i32
    %c0_i32_1 = arith.constant 0 : i32
    return %c0_i32, %c0_i32_0 : i32, i32
  }
  func.func @transform_1(%arg0: i32, %arg1: i32) -> (i32, i32) {
    %c0_i32 = arith.constant 0 : i32
    %c0_i32_0 = arith.constant 0 : i32
    %c0_i32_1 = arith.constant 0 : i32
    return %c0_i32, %c0_i32_0 : i32, i32
  }
  func.func @transform_2(%arg0: i32, %arg1: i32) -> (i32, i32, i32) {
    %c0_i32 = arith.constant 0 : i32
    %c0_i32_0 = arith.constant 0 : i32
    return %arg0, %c0_i32, %arg1 : i32, i32, i32
  }
  func.func @transform_3(%arg0: i32, %arg1: i32) -> (i32, i32, i32) {
    %c0_i32 = arith.constant 0 : i32
    %c0_i32_0 = arith.constant 0 : i32
    %c0_i32_1 = arith.constant 0 : i32
    return %arg0, %c0_i32, %c0_i32_0 : i32, i32, i32
  }
}

</mosaic_0001>

<bundles_post_ra>
// kernel: tpu_custom_call.1
= control target key start
LH: loop header
LB: loop body
LE: loop exit
PB: predicated region body
PF: predicated region fallthrough
CT: control target
= control target key end

     0   :  { %8 = vsyncpa [#allocation5], 0  ;;  %s1141_s12 = smov [#allocation4]   ;;  %s1550_s0 = inlined_call_operand.vmem [shape: f32[80,8], index: 0, kind: input, shape index: {}]   ;;  %s1551_s1 = inlined_call_operand.vmem [shape: f32[80,8], index: 1, kind: input, shape index: {}]   ;;  %s1552_s2 = inlined_call_operand.hbm [shape: f32[2,80,256], index: 2, kind: input, shape index: {}]   ;;  %s1553_s3 = inlined_call_operand.vmem [shape: f32[2,80,1], index: 3, kind: output, shape index: {}]  }
   0x1   :  { %s18_s13 = sshll.u32 %s1141_s12, 4  ;;  %s1117_s16 = scalar_lea.hbm %s1552_s2, 5120  ;;  %s19_s13 = int_to_ptr.vmem [resolvable:$true] %s18_s13 }
   0x2   :  { %p1118_p0 = scmp.ne.s32.totalorder %s1552_s2, %s1117_s16  ;;  %p1121_p1 = scmp.lt.u32.totalorder %s1117_s16, %s1552_s2 }
   0x4   :  { %p1123_p2 = pnand %p1121_p1, %p1118_p0 }
   0x6   :  { %1126 = shalt.err (!%p1123_p2)
}
   0x7   :  { %s1127_s21 = scalar_lea.vmem %s19_s13, 5120  ;;  %p1132_p4 = scmp.lt.s32.totalorder %s19_s13, %s19_s13 }
   0x8   :  { %p1128_p3 = scmp.ne.s32.totalorder %s19_s13, %s1127_s21  ;;  %p1133_p5 = scmp.lt.s32.totalorder %s1127_s21, %s1127_s21 }
   0xa   :  { %p1134_p6 = por %p1133_p5, %p1132_p4 }
   0xc   :  { %p1135_p7 = pnand %p1134_p6, %p1128_p3 }
   0xe   :  { %1138 = shalt.err (!%p1135_p7)
}
   0xf   :  { %s1142_s22 = smov 256   ;;  %s1143_s23 = smov 16  }
  0x10   :  { %24 = dma.hbm_to_vmem [thread:$0]  %s1552_s2, 5120, %s19_s13, [#allocation5], %s1142_s22, %s1142_s22, %s1143_s23  }
  0x11   :  { %1139 = dma.done.wait [#allocation5], 5120  }
  0x12   :  { %1140 = vsyncadd [#allocation5], 4294962176  ;;  %vm32_vm0 = vcmask 7168   ;;  %v1144_v0 = vmov 0.0   ;;  %v1199_v1 = vld [vmem:[#allocation4 + $0x20] sm:$0xff]  ;;  %v1201_v2 = vld [vmem:[#allocation4 + $0x28] sm:$0xff] }
  0x13   :  { %35 = vst.msk [vmem:[#allocation2 + $0x10] sm:$0xff] %vm32_vm0, %v1144_v0  ;;  %33 = vst.msk [vmem:[#allocation2] sm:$0xff] %vm32_vm0, %v1144_v0  ;;  %v73_v3 = vld [vmem:[#allocation4] sm:$0xff]  ;;  %v139_v4 = vadd.f32 %v1201_v2, %v1199_v1  ;;  %v74_v5 = vld [vmem:[#allocation4 + $0x8] sm:$0xff]  ;;  %v260_v48 = vmax.f32 %v1199_v1, %v1201_v2  ;;  %v1145_v51 = vmov -inf   ;;  %vm557_vm1 = vcmask 64512  }
  0x14   :  { %34 = vst.msk [vmem:[#allocation2 + $0x8] sm:$0xff] %vm32_vm0, %v1144_v0  ;;  %36 = vst.msk [vmem:[#allocation2 + $0x18] sm:$0xff] %vm32_vm0, %v1144_v0  ;;  %v1205_v6 = vld [vmem:[#allocation4 + $0x30] sm:$0xff]  ;;  %v1207_v7 = vld [vmem:[#allocation4 + $0x38] sm:$0xff]  ;;  %v133_v8 = vadd.f32 %v74_v5, %v73_v3  ;;  %v254_v44 = vmax.f32 %v73_v3, %v74_v5  ;;  %v1146_v3 = vmov 0  }
  0x15   :  { %37 = vst.msk [vmem:[#allocation2 + $0x20] sm:$0xff] %vm32_vm0, %v1144_v0  ;;  %38 = vst.msk [vmem:[#allocation2 + $0x28] sm:$0xff] %vm32_vm0, %v1144_v0  ;;  %v75_v9 = vld [vmem:[#allocation4 + $0x10] sm:$0xff]  ;;  %v76_v10 = vld [vmem:[#allocation4 + $0x18] sm:$0xff]  ;;  %140 = vadd.xlane.f32.xlu1 %v139_v4  ;;  %v142_v11 = vadd.f32 %v1207_v7, %v1205_v6  ;;  %v263_v52 = vmax.f32 %v1205_v6, %v1207_v7  ;;  %1036 = vset.pattern.permute.xlu0 %v1146_v3 }
  0x16   :  { %39 = vst.msk [vmem:[#allocation2 + $0x30] sm:$0xff] %vm32_vm0, %v1144_v0  ;;  %40 = vst.msk [vmem:[#allocation2 + $0x38] sm:$0xff] %vm32_vm0, %v1144_v0  ;;  %134 = vadd.xlane.f32.xlu0 %v133_v8  ;;  %v136_v12 = vadd.f32 %v76_v10, %v75_v9  ;;  %v1211_v13 = vld [vmem:[#allocation4 + $0x50] sm:$0xff]  ;;  %v1213_v14 = vld [vmem:[#allocation4 + $0x58] sm:$0xff]  ;;  %v257_v43 = vmax.f32 %v75_v9, %v76_v10  ;;  %1035 = vset.pattern.permute.xlu1 %v1146_v3 }
  0x17   :  { %41 = vst.msk [vmem:[#allocation2 + $0x40] sm:$0xff] %vm32_vm0, %v1144_v0  ;;  %42 = vst.msk [vmem:[#allocation2 + $0x48] sm:$0xff] %vm32_vm0, %v1144_v0  ;;  %v1215_v15 = vld [vmem:[#allocation4 + $0x40] sm:$0xff]  ;;  %v1217_v16 = vld [vmem:[#allocation4 + $0x48] sm:$0xff]  ;;  %v148_v17 = vadd.f32 %v1213_v14, %v1211_v13  ;;  %v269_v62 = vmax.f32 %v1211_v13, %v1213_v14 }
  0x18   :  { %43 = vst.msk [vmem:[#allocation2 + $0x50] sm:$0xff] %vm32_vm0, %v1144_v0  ;;  %44 = vst.msk [vmem:[#allocation2 + $0x58] sm:$0xff] %vm32_vm0, %v1144_v0  ;;  %v145_v18 = vadd.f32 %v1217_v16, %v1215_v15  ;;  %v1223_v19 = vld [vmem:[#allocation4 + $0x70] sm:$0xff]  ;;  %v1225_v20 = vld [vmem:[#allocation4 + $0x78] sm:$0xff]  ;;  %v266_v59 = vmax.f32 %v1215_v15, %v1217_v16 }
  0x19   :  { %45 = vst.msk [vmem:[#allocation2 + $0x60] sm:$0xff] %vm32_vm0, %v1144_v0  ;;  %46 = vst.msk [vmem:[#allocation2 + $0x68] sm:$0xff] %vm32_vm0, %v1144_v0  ;;  %143 = vadd.xlane.f32.xlu1 %v142_v11  ;;  %v1227_v21 = vld [vmem:[#allocation4 + $0x60] sm:$0xff]  ;;  %v1229_v22 = vld [vmem:[#allocation4 + $0x68] sm:$0xff]  ;;  %v154_v23 = vadd.f32 %v1225_v20, %v1223_v19  ;;  %v275_v9 = vmax.f32 %v1223_v19, %v1225_v20 }
  0x1a   :  { %47 = vst.msk [vmem:[#allocation2 + $0x70] sm:$0xff] %vm32_vm0, %v1144_v0  ;;  %48 = vst.msk [vmem:[#allocation2 + $0x78] sm:$0xff] %vm32_vm0, %v1144_v0  ;;  %137 = vadd.xlane.f32.xlu0 %v136_v12  ;;  %v151_v24 = vadd.f32 %v1229_v22, %v1227_v21  ;;  %v1235_v25 = vld [vmem:[#allocation4 + $0x90] sm:$0xff]  ;;  %v1237_v26 = vld [vmem:[#allocation4 + $0x98] sm:$0xff]  ;;  %v272_v6 = vmax.f32 %v1227_v21, %v1229_v22 }
  0x1b   :  { %49 = vst.msk [vmem:[#allocation2 + $0x80] sm:$0xff] %vm32_vm0, %v1144_v0  ;;  %50 = vst.msk [vmem:[#allocation2 + $0x88] sm:$0xff] %vm32_vm0, %v1144_v0  ;;  %v1239_v27 = vld [vmem:[#allocation4 + $0x80] sm:$0xff]  ;;  %v1241_v28 = vld [vmem:[#allocation4 + $0x88] sm:$0xff]  ;;  %v160_v29 = vadd.f32 %v1237_v26, %v1235_v25 }
  0x1c   :  { %51 = vst.msk [vmem:[#allocation2 + $0x90] sm:$0xff] %vm32_vm0, %v1144_v0  ;;  %52 = vst.msk [vmem:[#allocation2 + $0x98] sm:$0xff] %vm32_vm0, %v1144_v0  ;;  %v157_v30 = vadd.f32 %v1241_v28, %v1239_v27  ;;  %v95_v31 = vld [vmem:[#allocation4 + $0xb0] sm:$0xff]  ;;  %v96_v32 = vld [vmem:[#allocation4 + $0xb8] sm:$0xff]  ;;  %v278_v16 = vmax.f32 %v1239_v27, %v1241_v28 }
  0x1d   :  { %149 = vadd.xlane.f32.xlu1 %v148_v17  ;;  %v93_v33 = vld [vmem:[#allocation4 + $0xa0] sm:$0xff]  ;;  %v94_v34 = vld [vmem:[#allocation4 + $0xa8] sm:$0xff]  ;;  %v166_v35 = vadd.f32 %v96_v32, %v95_v31  ;;  %v99_v37 = vld [vmem:[#allocation4 + $0xd0] sm:$0xff]  ;;  %v287_v45 = vmax.f32 %v95_v31, %v96_v32  ;;  %54 = vst.msk [vmem:[#allocation3 + $0x8] sm:$0xff] %vm32_vm0, %v1145_v51 }
  0x1e   :  { %146 = vadd.xlane.f32.xlu0 %v145_v18  ;;  %v163_v36 = vadd.f32 %v94_v34, %v93_v33  ;;  %v100_v38 = vld [vmem:[#allocation4 + $0xd8] sm:$0xff]  ;;  %v97_v39 = vld [vmem:[#allocation4 + $0xc0] sm:$0xff]  ;;  %v98_v40 = vld [vmem:[#allocation4 + $0xc8] sm:$0xff]  ;;  %v284_v46 = vmax.f32 %v93_v33, %v94_v34  ;;  %53 = vst.msk [vmem:[#allocation3] sm:$0xff] %vm32_vm0, %v1145_v51  ;;  %v281_v18 = vmax.f32 %v1235_v25, %v1237_v26 }
  0x1f   :  { %v172_v41 = vadd.f32 %v100_v38, %v99_v37  ;;  %v169_v42 = vadd.f32 %v98_v40, %v97_v39  ;;  %v290_v47 = vmax.f32 %v97_v39, %v98_v40  ;;  %v101_v49 = vld [vmem:[#allocation4 + $0xe0] sm:$0xff]  ;;  %v102_v50 = vld [vmem:[#allocation4 + $0xe8] sm:$0xff]  ;;  %55 = vst.msk [vmem:[#allocation3 + $0x10] sm:$0xff] %vm32_vm0, %v1145_v51  ;;  %56 = vst.msk [vmem:[#allocation3 + $0x18] sm:$0xff] %vm32_vm0, %v1145_v51 }
  0x20   :  { %57 = vst.msk [vmem:[#allocation3 + $0x20] sm:$0xff] %vm32_vm0, %v1145_v51  ;;  %58 = vst.msk [vmem:[#allocation3 + $0x28] sm:$0xff] %vm32_vm0, %v1145_v51  ;;  %v175_v53 = vadd.f32 %v102_v50, %v101_v49  ;;  %v103_v54 = vld [vmem:[#allocation4 + $0xf0] sm:$0xff]  ;;  %v104_v55 = vld [vmem:[#allocation4 + $0xf8] sm:$0xff]  ;;  %v293_v57 = vmax.f32 %v99_v37, %v100_v38  ;;  %v296_v58 = vmax.f32 %v101_v49, %v102_v50 }
  0x21   :  { %155 = vadd.xlane.f32.xlu1 %v154_v23  ;;  %59 = vst.msk [vmem:[#allocation3 + $0x30] sm:$0xff] %vm32_vm0, %v1145_v51  ;;  %60 = vst.msk [vmem:[#allocation3 + $0x38] sm:$0xff] %vm32_vm0, %v1145_v51  ;;  %v178_v56 = vadd.f32 %v104_v55, %v103_v54  ;;  %v105_v60 = vld [vmem:[#allocation4 + $0x100] sm:$0xff]  ;;  %v106_v61 = vld [vmem:[#allocation4 + $0x108] sm:$0xff]  ;;  %v299_v4 = vmax.f32 %v103_v54, %v104_v55 }
  0x22   :  { %152 = vadd.xlane.f32.xlu0 %v151_v24  ;;  %61 = vst.msk [vmem:[#allocation3 + $0x40] sm:$0xff] %vm32_vm0, %v1145_v51  ;;  %62 = vst.msk [vmem:[#allocation3 + $0x48] sm:$0xff] %vm32_vm0, %v1145_v51  ;;  %v181_v63 = vadd.f32 %v106_v61, %v105_v60  ;;  %v107_v0 = vld [vmem:[#allocation4 + $0x110] sm:$0xff]  ;;  %v108_v1 = vld [vmem:[#allocation4 + $0x118] sm:$0xff]  ;;  %v302_v5 = vmax.f32 %v105_v60, %v106_v61 }
  0x23   :  { %63 = vst.msk [vmem:[#allocation3 + $0x50] sm:$0xff] %vm32_vm0, %v1145_v51  ;;  %64 = vst.msk [vmem:[#allocation3 + $0x58] sm:$0xff] %vm32_vm0, %v1145_v51  ;;  %v184_v2 = vadd.f32 %v108_v1, %v107_v0  ;;  %v109_v7 = vld [vmem:[#allocation4 + $0x120] sm:$0xff]  ;;  %v110_v8 = vld [vmem:[#allocation4 + $0x128] sm:$0xff]  ;;  %v305_v14 = vmax.f32 %v107_v0, %v108_v1 }
  0x24   :  { %65 = vst.msk [vmem:[#allocation3 + $0x60] sm:$0xff] %vm32_vm0, %v1145_v51  ;;  %66 = vst.msk [vmem:[#allocation3 + $0x68] sm:$0xff] %vm32_vm0, %v1145_v51  ;;  %v187_v10 = vadd.f32 %v110_v8, %v109_v7  ;;  %v111_v11 = vld [vmem:[#allocation4 + $0x130] sm:$0xff]  ;;  %v112_v12 = vld [vmem:[#allocation4 + $0x138] sm:$0xff]  ;;  %v308_v15 = vmax.f32 %v109_v7, %v110_v8 }
  0x25   :  { %161 = vadd.xlane.f32.xlu1 %v160_v29  ;;  %67 = vst.msk [vmem:[#allocation3 + $0x70] sm:$0xff] %vm32_vm0, %v1145_v51  ;;  %68 = vst.msk [vmem:[#allocation3 + $0x78] sm:$0xff] %vm32_vm0, %v1145_v51  ;;  %v190_v13 = vadd.f32 %v112_v12, %v111_v11  ;;  %v311_v17 = vmax.f32 %v111_v11, %v112_v12  ;;  %v115_v19 = vld [vmem:[#allocation2 + $0x10] sm:$0xff]  ;;  %v113_v20 = vld [vmem:[#allocation2] sm:$0xff] }
  0x26   :  { %158 = vadd.xlane.f32.xlu0 %v157_v30  ;;  %69 = vst.msk [vmem:[#allocation3 + $0x80] sm:$0xff] %vm32_vm0, %v1145_v51  ;;  %70 = vst.msk [vmem:[#allocation3 + $0x88] sm:$0xff] %vm32_vm0, %v1145_v51  ;;  %v116_v29 = vld [vmem:[#allocation2 + $0x18] sm:$0xff]  ;;  %v114_v30 = vld [vmem:[#allocation2 + $0x8] sm:$0xff] }
  0x27   :  { %71 = vst.msk [vmem:[#allocation3 + $0x90] sm:$0xff] %vm32_vm0, %v1145_v51  ;;  %72 = vst.msk [vmem:[#allocation3 + $0x98] sm:$0xff] %vm32_vm0, %v1145_v51  ;;  %v118_v33 = vld [vmem:[#allocation2 + $0x28] sm:$0xff]  ;;  %v117_v25 = vld [vmem:[#allocation2 + $0x20] sm:$0xff] }
  0x28   :  { %v120_v37 = vld [vmem:[#allocation2 + $0x38] sm:$0xff]  ;;  %v119_v38 = vld [vmem:[#allocation2 + $0x30] sm:$0xff]  ;;  %v126_v55 = vld [vmem:[#allocation2 + $0x68] sm:$0xff] }
  0x29   :  { %167 = vadd.xlane.f32.xlu1 %v166_v35  ;;  %v124_v49 = vld [vmem:[#allocation2 + $0x58] sm:$0xff]  ;;  %v123_v50 = vld [vmem:[#allocation2 + $0x50] sm:$0xff]  ;;  %v235_v61 = vld [vmem:[#allocation3 + $0x8] sm:$0xff] }
  0x2a   :  { %164 = vadd.xlane.f32.xlu0 %v163_v36  ;;  %v245_v3 = vld [vmem:[#allocation3 + $0x58] sm:$0xff] }
  0x2d   :  { %173 = vadd.xlane.f32.xlu1 %v172_v41 }
  0x2e   :  { %170 = vadd.xlane.f32.xlu0 %v169_v42 }
  0x31   :  { %258 = vmax.xlane.f32.xlu1 %v257_v43  ;;  %v122_v43 = vld [vmem:[#allocation2 + $0x48] sm:$0xff] }
  0x32   :  { %255 = vmax.xlane.f32.xlu0 %v254_v44  ;;  %v121_v44 = vld [vmem:[#allocation2 + $0x40] sm:$0xff] }
  0x35   :  { %288 = vmax.xlane.f32.xlu1 %v287_v45 }
  0x36   :  { %285 = vmax.xlane.f32.xlu0 %v284_v46 }
  0x39   :  { %291 = vmax.xlane.f32.xlu1 %v290_v47 }
  0x3a   :  { %261 = vmax.xlane.f32.xlu0 %v260_v48 }
  0x3d   :  { %264 = vmax.xlane.f32.xlu1 %v263_v52 }
  0x3e   :  { %176 = vadd.xlane.f32.xlu0 %v175_v53 }
  0x41   :  { %179 = vadd.xlane.f32.xlu1 %v178_v56  ;;  %v125_v56 = vld [vmem:[#allocation2 + $0x60] sm:$0xff] }
  0x42   :  { %294 = vmax.xlane.f32.xlu0 %v293_v57 }
  0x45   :  { %297 = vmax.xlane.f32.xlu1 %v296_v58 }
  0x46   :  { %267 = vmax.xlane.f32.xlu0 %v266_v59 }
  0x49   :  { %270 = vmax.xlane.f32.xlu1 %v269_v62  ;;  %v234_v62 = vld [vmem:[#allocation3] sm:$0xff] }
  0x4a   :  { %182 = vadd.xlane.f32.xlu0 %v181_v63 }
  0x4d   :  { %185 = vadd.xlane.f32.xlu1 %v184_v2 }
  0x4e   :  { %300 = vmax.xlane.f32.xlu0 %v299_v4  ;;  %v244_v4 = vld [vmem:[#allocation3 + $0x50] sm:$0xff] }
  0x51   :  { %303 = vmax.xlane.f32.xlu1 %v302_v5 }
  0x52   :  { %273 = vmax.xlane.f32.xlu0 %v272_v6 }
  0x55   :  { %276 = vmax.xlane.f32.xlu1 %v275_v9  ;;  %v246_v9 = vld [vmem:[#allocation3 + $0x60] sm:$0xff] }
  0x56   :  { %188 = vadd.xlane.f32.xlu0 %v187_v10  ;;  %v236_v10 = vld [vmem:[#allocation3 + $0x10] sm:$0xff] }
  0x59   :  { %191 = vadd.xlane.f32.xlu1 %v190_v13 }
  0x5a   :  { %306 = vmax.xlane.f32.xlu0 %v305_v14 }
  0x5d   :  { %309 = vmax.xlane.f32.xlu1 %v308_v15  ;;  %v237_v15 = vld [vmem:[#allocation3 + $0x18] sm:$0xff] }
  0x5e   :  { %279 = vmax.xlane.f32.xlu0 %v278_v16 }
  0x61   :  { %312 = vmax.xlane.f32.xlu1 %v311_v17  ;;  %v127_v17 = vld [vmem:[#allocation2 + $0x70] sm:$0xff] }
  0x62   :  { %282 = vmax.xlane.f32.xlu0 %v281_v18 }
  0xa2   :  { %v141_v21 = vpop.xlane.xlu1 %140 }
  0xa3   :  { %v195_v22 = vadd.f32 %v141_v21, %v115_v19  ;;  %v135_v23 = vpop.xlane.xlu0 %134 }
  0xa4   :  { %v193_v24 = vadd.f32 %v135_v23, %v113_v20  ;;  %v128_v23 = vld [vmem:[#allocation2 + $0x78] sm:$0xff] }
  0xa5   :  { %216 = vst.msk [vmem:[#allocation2 + $0x10] sm:$0xff] %vm32_vm0, %v195_v22 }
  0xa6   :  { %214 = vst.msk [vmem:[#allocation2] sm:$0xff] %vm32_vm0, %v193_v24  ;;  %v144_v27 = vpop.xlane.xlu1 %143  ;;  %v247_v24 = vld [vmem:[#allocation3 + $0x68] sm:$0xff] }
  0xa7   :  { %v196_v28 = vadd.f32 %v144_v27, %v116_v29  ;;  %v138_v31 = vpop.xlane.xlu0 %137 }
  0xa8   :  { %v194_v32 = vadd.f32 %v138_v31, %v114_v30  ;;  %v248_v31 = vld [vmem:[#allocation3 + $0x70] sm:$0xff] }
  0xa9   :  { %217 = vst.msk [vmem:[#allocation2 + $0x18] sm:$0xff] %vm32_vm0, %v196_v28 }
  0xaa   :  { %215 = vst.msk [vmem:[#allocation2 + $0x8] sm:$0xff] %vm32_vm0, %v194_v32  ;;  %v150_v26 = vpop.xlane.xlu1 %149 }
  0xab   :  { %v198_v34 = vadd.f32 %v150_v26, %v118_v33  ;;  %v147_v35 = vpop.xlane.xlu0 %146 }
  0xac   :  { %v197_v36 = vadd.f32 %v147_v35, %v117_v25  ;;  %v238_v25 = vld [vmem:[#allocation3 + $0x20] sm:$0xff] }
  0xad   :  { %219 = vst.msk [vmem:[#allocation2 + $0x28] sm:$0xff] %vm32_vm0, %v198_v34 }
  0xae   :  { %218 = vst.msk [vmem:[#allocation2 + $0x20] sm:$0xff] %vm32_vm0, %v197_v36  ;;  %v156_v39 = vpop.xlane.xlu1 %155 }
  0xaf   :  { %v200_v40 = vadd.f32 %v156_v39, %v120_v37  ;;  %v153_v41 = vpop.xlane.xlu0 %152  ;;  %v239_v37 = vld [vmem:[#allocation3 + $0x28] sm:$0xff]  ;;  %v129_v39 = vld [vmem:[#allocation2 + $0x80] sm:$0xff] }
  0xb0   :  { %v199_v42 = vadd.f32 %v153_v41, %v119_v38 }
  0xb1   :  { %221 = vst.msk [vmem:[#allocation2 + $0x38] sm:$0xff] %vm32_vm0, %v200_v40 }
  0xb2   :  { %220 = vst.msk [vmem:[#allocation2 + $0x30] sm:$0xff] %vm32_vm0, %v199_v42  ;;  %v162_v45 = vpop.xlane.xlu1 %161 }
  0xb3   :  { %v202_v46 = vadd.f32 %v162_v45, %v122_v43  ;;  %v159_v47 = vpop.xlane.xlu0 %158 }
  0xb4   :  { %v201_v48 = vadd.f32 %v159_v47, %v121_v44  ;;  %v130_v44 = vld [vmem:[#allocation2 + $0x88] sm:$0xff]  ;;  %v249_v47 = vld [vmem:[#allocation3 + $0x78] sm:$0xff] }
  0xb5   :  { %223 = vst.msk [vmem:[#allocation2 + $0x48] sm:$0xff] %vm32_vm0, %v202_v46 }
  0xb6   :  { %222 = vst.msk [vmem:[#allocation2 + $0x40] sm:$0xff] %vm32_vm0, %v201_v48  ;;  %v168_v51 = vpop.xlane.xlu1 %167 }
  0xb7   :  { %v204_v52 = vadd.f32 %v168_v51, %v124_v49  ;;  %v165_v53 = vpop.xlane.xlu0 %164 }
  0xb8   :  { %v203_v54 = vadd.f32 %v165_v53, %v123_v50  ;;  %v250_v53 = vld [vmem:[#allocation3 + $0x80] sm:$0xff] }
  0xb9   :  { %225 = vst.msk [vmem:[#allocation2 + $0x58] sm:$0xff] %vm32_vm0, %v204_v52 }
  0xba   :  { %224 = vst.msk [vmem:[#allocation2 + $0x50] sm:$0xff] %vm32_vm0, %v203_v54  ;;  %v174_v57 = vpop.xlane.xlu1 %173 }
  0xbb   :  { %v206_v58 = vadd.f32 %v174_v57, %v126_v55  ;;  %v171_v59 = vpop.xlane.xlu0 %170  ;;  %v240_v55 = vld [vmem:[#allocation3 + $0x30] sm:$0xff] }
  0xbc   :  { %v205_v60 = vadd.f32 %v171_v59, %v125_v56 }
  0xbd   :  { %227 = vst.msk [vmem:[#allocation2 + $0x68] sm:$0xff] %vm32_vm0, %v206_v58 }
  0xbe   :  { %226 = vst.msk [vmem:[#allocation2 + $0x60] sm:$0xff] %vm32_vm0, %v205_v60  ;;  %v259_v63 = vpop.xlane.xlu1 %258  ;;  %v241_v60 = vld [vmem:[#allocation3 + $0x38] sm:$0xff] }
  0xbf   :  { %v315_v0 = vmax.f32 %v235_v61, %v259_v63  ;;  %v256_v1 = vpop.xlane.xlu0 %255 }
  0xc0   :  { %v314_v2 = vmax.f32 %v234_v62, %v256_v1  ;;  %v131_v62 = vld [vmem:[#allocation2 + $0x90] sm:$0xff] }
  0xc1   :  { %335 = vst.msk [vmem:[#allocation3 + $0x8] sm:$0xff] %vm32_vm0, %v315_v0 }
  0xc2   :  { %334 = vst.msk [vmem:[#allocation3] sm:$0xff] %vm32_vm0, %v314_v2  ;;  %v289_v5 = vpop.xlane.xlu1 %288 }
  0xc3   :  { %v325_v6 = vmax.f32 %v245_v3, %v289_v5  ;;  %v286_v7 = vpop.xlane.xlu0 %285 }
  0xc4   :  { %v324_v8 = vmax.f32 %v244_v4, %v286_v7  ;;  %v132_v4 = vld [vmem:[#allocation2 + $0x98] sm:$0xff] }
  0xc5   :  { %345 = vst.msk [vmem:[#allocation3 + $0x58] sm:$0xff] %vm32_vm0, %v325_v6  ;;  %v251_v6 = vld [vmem:[#allocation3 + $0x88] sm:$0xff] }
  0xc6   :  { %344 = vst.msk [vmem:[#allocation3 + $0x50] sm:$0xff] %vm32_vm0, %v324_v8  ;;  %v292_v11 = vpop.xlane.xlu1 %291 }
  0xc7   :  { %v326_v12 = vmax.f32 %v246_v9, %v292_v11  ;;  %v262_v13 = vpop.xlane.xlu0 %261 }
  0xc8   :  { %v316_v14 = vmax.f32 %v236_v10, %v262_v13  ;;  %v398_v21 = vld [vmem:[#allocation3 + $0x8] sm:$0xff]  ;;  %v242_v13 = vld [vmem:[#allocation3 + $0x40] sm:$0xff] }
  0xc9   :  { %346 = vst.msk [vmem:[#allocation3 + $0x60] sm:$0xff] %vm32_vm0, %v326_v12  ;;  %v397_v16 = vld [vmem:[#allocation3] sm:$0xff]  ;;  %v252_v12 = vld [vmem:[#allocation3 + $0x90] sm:$0xff] }
  0xca   :  { %336 = vst.msk [vmem:[#allocation3 + $0x10] sm:$0xff] %vm32_vm0, %v316_v14  ;;  %612 = vperm.xlu1 %1035, %v397_v16   ;;  %v265_v18 = vpop.xlane.xlu1 %264  ;;  %v357_v16 = vld [vmem:[#allocation2] sm:$0xff] }
  0xcb   :  { %v317_v19 = vmax.f32 %v237_v15, %v265_v18  ;;  %v177_v20 = vpop.xlane.xlu0 %176  ;;  %v358_v15 = vld [vmem:[#allocation2 + $0x8] sm:$0xff] }
  0xcc   :  { %v207_v22 = vadd.f32 %v177_v20, %v127_v17  ;;  %v408_v38 = vld [vmem:[#allocation3 + $0x58] sm:$0xff]  ;;  %v378_v20 = vmul.f32 0.00390625, %v358_v15 }
  0xcd   :  { %337 = vst.msk [vmem:[#allocation3 + $0x18] sm:$0xff] %vm32_vm0, %v317_v19  ;;  %v407_v33 = vld [vmem:[#allocation3 + $0x50] sm:$0xff] }
  0xce   :  { %228 = vst.msk [vmem:[#allocation2 + $0x70] sm:$0xff] %vm32_vm0, %v207_v22  ;;  %617 = vperm.xlu1 %1035, %v398_v21   ;;  %v180_v29 = vpop.xlane.xlu1 %179  ;;  %v377_v21 = vmul.f32 0.00390625, %v357_v16  ;;  %v253_v22 = vld [vmem:[#allocation3 + $0x98] sm:$0xff] }
  0xcf   :  { %v208_v30 = vadd.f32 %v180_v29, %v128_v23  ;;  %v295_v27 = vpop.xlane.xlu0 %294  ;;  %v369_v29 = vld [vmem:[#allocation2 + $0x60] sm:$0xff] }
  0xd0   :  { %v327_v28 = vmax.f32 %v247_v24, %v295_v27  ;;  %v409_v32 = vld [vmem:[#allocation3 + $0x60] sm:$0xff]  ;;  %v359_v24 = vld [vmem:[#allocation2 + $0x10] sm:$0xff] }
  0xd1   :  { %229 = vst.msk [vmem:[#allocation2 + $0x78] sm:$0xff] %vm32_vm0, %v208_v30  ;;  %672 = vperm.xlu0 %1036, %v409_v32   ;;  %v399_v46 = vld [vmem:[#allocation3 + $0x10] sm:$0xff]  ;;  %v243_v30 = vld [vmem:[#allocation3 + $0x48] sm:$0xff]  ;;  %v379_v32 = vmul.f32 0.00390625, %v359_v24 }
  0xd2   :  { %347 = vst.msk [vmem:[#allocation3 + $0x68] sm:$0xff] %vm32_vm0, %v327_v28  ;;  %662 = vperm.xlu1 %1035, %v407_v33   ;;  %v298_v26 = vpop.xlane.xlu1 %297  ;;  %v389_v33 = vmul.f32 0.00390625, %v369_v29 }
  0xd3   :  { %v328_v34 = vmax.f32 %v248_v31, %v298_v26  ;;  %v268_v35 = vpop.xlane.xlu0 %267  ;;  %v367_v26 = vld [vmem:[#allocation2 + $0x50] sm:$0xff] }
  0xd4   :  { %v318_v36 = vmax.f32 %v238_v25, %v268_v35  ;;  %v400_v54 = vld [vmem:[#allocation3 + $0x18] sm:$0xff]  ;;  %v387_v35 = vmul.f32 0.00390625, %v367_v26 }
  0xd5   :  { %348 = vst.msk [vmem:[#allocation3 + $0x70] sm:$0xff] %vm32_vm0, %v328_v34  ;;  %v370_v34 = vld [vmem:[#allocation2 + $0x68] sm:$0xff] }
  0xd6   :  { %338 = vst.msk [vmem:[#allocation3 + $0x20] sm:$0xff] %vm32_vm0, %v318_v36  ;;  %667 = vperm.xlu1 %1035, %v408_v38   ;;  %v271_v40 = vpop.xlane.xlu1 %270  ;;  %v390_v36 = vmul.f32 0.00390625, %v370_v34  ;;  %v371_v38 = vld [vmem:[#allocation2 + $0x70] sm:$0xff] }
  0xd7   :  { %v319_v41 = vmax.f32 %v239_v37, %v271_v40  ;;  %v183_v42 = vpop.xlane.xlu0 %182  ;;  %v368_v37 = vld [vmem:[#allocation2 + $0x58] sm:$0xff]  ;;  %v391_v40 = vmul.f32 0.00390625, %v371_v38 }
  0xd8   :  { %v209_v43 = vadd.f32 %v183_v42, %v129_v39  ;;  %v388_v39 = vmul.f32 0.00390625, %v368_v37  ;;  %v372_v42 = vld [vmem:[#allocation2 + $0x78] sm:$0xff] }
  0xd9   :  { %339 = vst.msk [vmem:[#allocation3 + $0x28] sm:$0xff] %vm32_vm0, %v319_v41  ;;  %v410_v45 = vld [vmem:[#allocation3 + $0x68] sm:$0xff]  ;;  %v360_v41 = vld [vmem:[#allocation2 + $0x18] sm:$0xff] }
  0xda   :  { %230 = vst.msk [vmem:[#allocation2 + $0x80] sm:$0xff] %vm32_vm0, %v209_v43  ;;  %677 = vperm.xlu0 %1036, %v410_v45   ;;  %622 = vperm.xlu1 %1035, %v399_v46   ;;  %v186_v48 = vpop.xlane.xlu1 %185  ;;  %v380_v43 = vmul.f32 0.00390625, %v360_v41  ;;  %v361_v45 = vld [vmem:[#allocation2 + $0x20] sm:$0xff] }
  0xdb   :  { %v210_v49 = vadd.f32 %v186_v48, %v130_v44  ;;  %v301_v50 = vpop.xlane.xlu0 %300  ;;  %v392_v44 = vmul.f32 0.00390625, %v372_v42 }
  0xdc   :  { %v329_v51 = vmax.f32 %v249_v47, %v301_v50  ;;  %v411_v52 = vld [vmem:[#allocation3 + $0x70] sm:$0xff]  ;;  %v381_v47 = vmul.f32 0.00390625, %v361_v45 }
  0xdd   :  { %231 = vst.msk [vmem:[#allocation2 + $0x88] sm:$0xff] %vm32_vm0, %v210_v49  ;;  %v401_v61 = vld [vmem:[#allocation3 + $0x20] sm:$0xff]  ;;  %v362_v49 = vld [vmem:[#allocation2 + $0x28] sm:$0xff] }
  0xde   :  { %349 = vst.msk [vmem:[#allocation3 + $0x78] sm:$0xff] %vm32_vm0, %v329_v51  ;;  %682 = vperm.xlu0 %1036, %v411_v52   ;;  %627 = vperm.xlu1 %1035, %v400_v54   ;;  %v304_v56 = vpop.xlane.xlu1 %303  ;;  %v382_v51 = vmul.f32 0.00390625, %v362_v49 }
  0xdf   :  { %v330_v57 = vmax.f32 %v250_v53, %v304_v56  ;;  %v274_v58 = vpop.xlane.xlu0 %273  ;;  %v363_v53 = vld [vmem:[#allocation2 + $0x30] sm:$0xff] }
  0xe0   :  { %v320_v59 = vmax.f32 %v240_v55, %v274_v58  ;;  %v402_v0 = vld [vmem:[#allocation3 + $0x28] sm:$0xff]  ;;  %v383_v56 = vmul.f32 0.00390625, %v363_v53 }
  0xe1   :  { %350 = vst.msk [vmem:[#allocation3 + $0x80] sm:$0xff] %vm32_vm0, %v330_v57  ;;  %v373_v46 = vld [vmem:[#allocation2 + $0x80] sm:$0xff]  ;;  %v364_v57 = vld [vmem:[#allocation2 + $0x38] sm:$0xff] }
  0xe2   :  { %340 = vst.msk [vmem:[#allocation3 + $0x30] sm:$0xff] %vm32_vm0, %v320_v59  ;;  %632 = vperm.xlu1 %1035, %v401_v61   ;;  %v277_v63 = vpop.xlane.xlu1 %276  ;;  %v393_v48 = vmul.f32 0.00390625, %v373_v46  ;;  %v384_v59 = vmul.f32 0.00390625, %v364_v57  ;;  %v419_v46 = vld [vmem:[%s1550_s0 + $0x10] sm:$0xff] }
  0xe3   :  { %v189_v1 = vpop.xlane.xlu0 %188  ;;  %v321_v2 = vmax.f32 %v241_v60, %v277_v63  ;;  %v365_v63 = vld [vmem:[#allocation2 + $0x40] sm:$0xff] }
  0xe4   :  { %v211_v3 = vadd.f32 %v189_v1, %v131_v62  ;;  %v374_v50 = vld [vmem:[#allocation2 + $0x88] sm:$0xff]  ;;  %v385_v1 = vmul.f32 0.00390625, %v365_v63 }
  0xe5   :  { %v412_v5 = vld [vmem:[#allocation3 + $0x78] sm:$0xff]  ;;  %341 = vst.msk [vmem:[#allocation3 + $0x38] sm:$0xff] %vm32_vm0, %v321_v2  ;;  %v394_v52 = vmul.f32 0.00390625, %v374_v50 }
  0xe6   :  { %687 = vperm.xlu0 %1036, %v412_v5   ;;  %637 = vperm.xlu1 %1035, %v402_v0   ;;  %232 = vst.msk [vmem:[#allocation2 + $0x90] sm:$0xff] %vm32_vm0, %v211_v3  ;;  %v192_v7 = vpop.xlane.xlu1 %191 }
  0xe7   :  { %v307_v8 = vpop.xlane.xlu0 %306  ;;  %v212_v9 = vadd.f32 %v192_v7, %v132_v4  ;;  %v366_v4 = vld [vmem:[#allocation2 + $0x48] sm:$0xff]  ;;  %v417_v7 = vld [vmem:[%s1550_s0] sm:$0xff] }
  0xe8   :  { %v413_v10 = vld [vmem:[#allocation3 + $0x80] sm:$0xff]  ;;  %v331_v11 = vmax.f32 %v251_v6, %v307_v8  ;;  %v386_v5 = vmul.f32 0.00390625, %v366_v4  ;;  %v422_v4 = vld [vmem:[%s1550_s0 + $0x28] sm:$0xff] }
  0xe9   :  { %v403_v14 = vld [vmem:[#allocation3 + $0x30] sm:$0xff]  ;;  %233 = vst.msk [vmem:[#allocation2 + $0x98] sm:$0xff] %vm32_vm0, %v212_v9  ;;  %v418_v9 = vld [vmem:[%s1550_s0 + $0x8] sm:$0xff] }
  0xea   :  { %692 = vperm.xlu0 %1036, %v413_v10   ;;  %642 = vperm.xlu1 %1035, %v403_v14   ;;  %351 = vst.msk [vmem:[#allocation3 + $0x88] sm:$0xff] %vm32_vm0, %v331_v11  ;;  %v310_v17 = vpop.xlane.xlu1 %309 }
  0xeb   :  { %v332_v18 = vmax.f32 %v252_v12, %v310_v17  ;;  %v280_v19 = vpop.xlane.xlu0 %279 }
  0xec   :  { %v322_v23 = vmax.f32 %v242_v13, %v280_v19  ;;  %v404_v60 = vld [vmem:[#allocation3 + $0x38] sm:$0xff] }
  0xed   :  { %352 = vst.msk [vmem:[#allocation3 + $0x90] sm:$0xff] %vm32_vm0, %v332_v18  ;;  %v375_v55 = vld [vmem:[#allocation2 + $0x90] sm:$0xff] }
  0xee   :  { %444 = vperm.xlu1 %1035, %v378_v20   ;;  %439 = vperm.xlu0 %1036, %v377_v21   ;;  %v313_v27 = vpop.xlane.xlu1 %312  ;;  %342 = vst.msk [vmem:[#allocation3 + $0x40] sm:$0xff] %vm32_vm0, %v322_v23  ;;  %v395_v58 = vmul.f32 0.00390625, %v375_v55 }
  0xef   :  { %v333_v28 = vmax.f32 %v253_v22, %v313_v27  ;;  %v283_v31 = vpop.xlane.xlu0 %282 }
  0xf0   :  { %v323_v25 = vmax.f32 %v243_v30, %v283_v31  ;;  %v376_v62 = vld [vmem:[#allocation2 + $0x98] sm:$0xff] }
  0xf1   :  { %353 = vst.msk [vmem:[#allocation3 + $0x98] sm:$0xff] %vm32_vm0, %v333_v28  ;;  %v414_v54 = vld [vmem:[#allocation3 + $0x88] sm:$0xff]  ;;  %v396_v0 = vmul.f32 0.00390625, %v376_v62 }
  0xf2   :  { %449 = vperm.xlu1 %1035, %v379_v32   ;;  %499 = vperm.xlu0 %1036, %v389_v33   ;;  %343 = vst.msk [vmem:[#allocation3 + $0x48] sm:$0xff] %vm32_vm0, %v323_v25 }
  0xf4   :  { %v415_v61 = vld [vmem:[#allocation3 + $0x90] sm:$0xff] }
  0xf5   :  { %v405_v2 = vld [vmem:[#allocation3 + $0x40] sm:$0xff] }
  0xf6   :  { %489 = vperm.xlu1 %1035, %v387_v35   ;;  %504 = vperm.xlu0 %1036, %v390_v36  }
  0xf8   :  { %v416_v3 = vld [vmem:[#allocation3 + $0x98] sm:$0xff] }
  0xf9   :  { %v406_v6 = vld [vmem:[#allocation3 + $0x48] sm:$0xff] }
  0xfa   :  { %494 = vperm.xlu1 %1035, %v388_v39   ;;  %509 = vperm.xlu0 %1036, %v391_v40  }
  0xfe   :  { %454 = vperm.xlu1 %1035, %v380_v43   ;;  %514 = vperm.xlu0 %1036, %v392_v44  }
 0x102   :  { %459 = vperm.xlu1 %1035, %v381_v47   ;;  %519 = vperm.xlu0 %1036, %v393_v48  }
 0x106   :  { %464 = vperm.xlu1 %1035, %v382_v51   ;;  %524 = vperm.xlu0 %1036, %v394_v52   ;;  %v420_v52 = vld [vmem:[%s1550_s0 + $0x18] sm:$0xff] }
 0x10a   :  { %469 = vperm.xlu1 %1035, %v383_v56   ;;  %697 = vperm.xlu0 %1036, %v414_v54  }
 0x10e   :  { %474 = vperm.xlu1 %1035, %v384_v59   ;;  %529 = vperm.xlu0 %1036, %v395_v58  }
 0x112   :  { %647 = vperm.xlu1 %1035, %v404_v60   ;;  %702 = vperm.xlu0 %1036, %v415_v61  }
 0x116   :  { %479 = vperm.xlu1 %1035, %v385_v1   ;;  %534 = vperm.xlu0 %1036, %v396_v0   ;;  %v421_v0 = vld [vmem:[%s1550_s0 + $0x20] sm:$0xff] }
 0x11a   :  { %652 = vperm.xlu1 %1035, %v405_v2   ;;  %707 = vperm.xlu0 %1036, %v416_v3  }
 0x11e   :  { %484 = vperm.xlu1 %1035, %v386_v5  }
 0x122   :  { %657 = vperm.xlu1 %1035, %v406_v6  }
 0x149   :  { %v613_v8 = vpop.permute.xlu1 %612 }
 0x14a   :  { %v710_v10 = vmul.f32 %v613_v8, %v417_v7 }
 0x14c   :  { %v730_v13 = vsel %vm557_vm1, %v710_v10, 0.0 }
 0x14d   :  { %v618_v11 = vpop.permute.xlu1 %617 }
 0x14e   :  { %v711_v12 = vmul.f32 %v618_v11, %v418_v9 }
 0x150   :  { %v731_v14 = vsel %vm557_vm1, %v711_v12, 0.0  ;;  %v673_v18 = vpop.permute.xlu0 %672 }
 0x151   :  { %v1331_v15 = vadd.f32 %v731_v14, %v730_v13  ;;  %v663_v16 = vpop.permute.xlu1 %662  ;;  %v722_v51 = vmul.f32 %v673_v18, %v419_v46 }
 0x152   :  { %v720_v17 = vmul.f32 %v663_v16, %v417_v7 }
 0x153   :  { %v758_v63 = vsel %vm557_vm1, %v722_v51, 0.0 }
 0x154   :  { %v755_v21 = vsel %vm557_vm1, %v720_v17, 0.0 }
 0x155   :  { %v668_v19 = vpop.permute.xlu1 %667 }
 0x156   :  { %v721_v20 = vmul.f32 %v668_v19, %v418_v9 }
 0x158   :  { %v756_v22 = vsel %vm557_vm1, %v721_v20, 0.0 }
 0x159   :  { %v757_v23 = vadd.f32 %v756_v22, %v755_v21  ;;  %v623_v24 = vpop.permute.xlu1 %622  ;;  %v678_v29 = vpop.permute.xlu0 %677 }
 0x15a   :  { %v712_v53 = vmul.f32 %v623_v24, %v419_v46  ;;  %v723_v61 = vmul.f32 %v678_v29, %v420_v52 }
 0x15b   :  { %v759_v2 = vadd.f32 %v758_v63, %v757_v23 }
 0x15c   :  { %v733_v3 = vsel %vm557_vm1, %v712_v53, 0.0  ;;  %v760_v13 = vsel %vm557_vm1, %v723_v61, 0.0 }
 0x15d   :  { %v628_v30 = vpop.permute.xlu1 %627  ;;  %v683_v27 = vpop.permute.xlu0 %682  ;;  %v734_v21 = vadd.f32 %v733_v3, %v1331_v15 }
 0x15e   :  { %v713_v62 = vmul.f32 %v628_v30, %v420_v52  ;;  %v724_v14 = vmul.f32 %v683_v27, %v421_v0  ;;  %v423_v27 = vld [vmem:[%s1550_s0 + $0x30] sm:$0xff] }
 0x160   :  { %v735_v16 = vsel %vm557_vm1, %v713_v62, 0.0 }
 0x161   :  { %v633_v28 = vpop.permute.xlu1 %632 }
 0x162   :  { %v714_v17 = vmul.f32 %v633_v28, %v421_v0 }
 0x165   :  { %v688_v31 = vpop.permute.xlu0 %687  ;;  %v1335_v32 = vpop.permute.xlu1 %637 }
 0x166   :  { %v725_v18 = vmul.f32 %v688_v31, %v422_v4  ;;  %v715_v15 = vmul.f32 %v1335_v32, %v422_v4 }
 0x169   :  { %v1337_v33 = vpop.permute.xlu0 %692  ;;  %v1339_v25 = vpop.permute.xlu1 %642 }
 0x16d   :  { %v445_v26 = vpop.permute.xlu1 %444  ;;  %v440_v34 = vpop.permute.xlu0 %439 }
 0x16e   :  { %v538_v58 = vmul.f32 %v445_v26, %v418_v9  ;;  %v537_v59 = vmul.f32 %v440_v34, %v417_v7  ;;  %v761_v26 = vadd.f32 %v760_v13, %v759_v2 }
 0x170   :  { %v558_v10 = vsel %vm557_vm1, %v537_v59, 0.0 }
 0x171   :  { %v450_v35 = vpop.permute.xlu1 %449  ;;  %v500_v36 = vpop.permute.xlu0 %499 }
 0x172   :  { %v549_v54 = vmul.f32 %v500_v36, %v419_v46  ;;  %v539_v1 = vmul.f32 %v450_v35, %v419_v46  ;;  %v762_v35 = vsel %vm557_vm1, %v724_v14, 0.0  ;;  %v736_v36 = vadd.f32 %v735_v16, %v734_v21 }
 0x173   :  { %v763_v51 = vadd.f32 %v762_v35, %v761_v26 }
 0x174   :  { %v586_v5 = vsel %vm557_vm1, %v549_v54, 0.0  ;;  %v561_v19 = vsel %vm557_vm1, %v539_v1, 0.0 }
 0x175   :  { %v490_v37 = vpop.permute.xlu1 %489  ;;  %v505_v38 = vpop.permute.xlu0 %504 }
 0x176   :  { %v547_v47 = vmul.f32 %v490_v37, %v417_v7  ;;  %v550_v6 = vmul.f32 %v505_v38, %v420_v52  ;;  %v737_v38 = vsel %vm557_vm1, %v714_v17, 0.0 }
 0x178   :  { %v583_v55 = vsel %vm557_vm1, %v547_v47, 0.0  ;;  %v588_v23 = vsel %vm557_vm1, %v550_v6, 0.0 }
 0x179   :  { %v495_v39 = vpop.permute.xlu1 %494  ;;  %v510_v40 = vpop.permute.xlu0 %509 }
 0x17a   :  { %v548_v45 = vmul.f32 %v495_v39, %v418_v9  ;;  %v559_v9 = vsel %vm557_vm1, %v538_v58, 0.0  ;;  %v551_v24 = vmul.f32 %v510_v40, %v421_v0  ;;  %v764_v39 = vsel %vm557_vm1, %v725_v18, 0.0 }
 0x17b   :  { %v560_v22 = vadd.f32 %v559_v9, %v558_v10  ;;  %v765_v59 = vadd.f32 %v764_v39, %v763_v51 }
 0x17c   :  { %v584_v50 = vsel %vm557_vm1, %v548_v45, 0.0  ;;  %v590_v45 = vsel %vm557_vm1, %v551_v24, 0.0 }
 0x17d   :  { %v455_v41 = vpop.permute.xlu1 %454  ;;  %v1341_v42 = vpop.permute.xlu0 %514  ;;  %v585_v60 = vadd.f32 %v584_v50, %v583_v55  ;;  %v562_v37 = vadd.f32 %v561_v19, %v560_v22  ;;  %v738_v55 = vadd.f32 %v737_v38, %v736_v36 }
 0x17e   :  { %v540_v12 = vmul.f32 %v455_v41, %v420_v52  ;;  %v552_v47 = vmul.f32 %v1341_v42, %v422_v4  ;;  %v425_v42 = vld [vmem:[%s1550_s0 + $0x40] sm:$0xff] }
 0x17f   :  { %v587_v11 = vadd.f32 %v586_v5, %v585_v60 }
 0x180   :  { %v563_v28 = vsel %vm557_vm1, %v540_v12, 0.0 }
 0x181   :  { %v460_v43 = vpop.permute.xlu1 %459  ;;  %v1343_v44 = vpop.permute.xlu0 %519  ;;  %v589_v34 = vadd.f32 %v588_v23, %v587_v11  ;;  %v564_v46 = vadd.f32 %v563_v28, %v562_v37 }
 0x182   :  { %v541_v20 = vmul.f32 %v460_v43, %v421_v0  ;;  %v726_v43 = vmul.f32 %v1337_v33, %v423_v27  ;;  %v716_v33 = vmul.f32 %v1339_v25, %v423_v27  ;;  %v553_v60 = vmul.f32 %v1343_v44, %v423_v27 }
 0x183   :  { %v591_v52 = vadd.f32 %v590_v45, %v589_v34  ;;  %v592_v0 = vsel %vm557_vm1, %v552_v47, 0.0 }
 0x184   :  { %v565_v40 = vsel %vm557_vm1, %v541_v20, 0.0  ;;  %v766_v63 = vsel %vm557_vm1, %v726_v43, 0.0  ;;  %v741_v9 = vsel %vm557_vm1, %v716_v33, 0.0  ;;  %v594_v13 = vsel %vm557_vm1, %v553_v60, 0.0 }
 0x185   :  { %v465_v48 = vpop.permute.xlu1 %464  ;;  %v1348_v49 = vpop.permute.xlu0 %524  ;;  %v566_v58 = vadd.f32 %v565_v40, %v564_v46  ;;  %v767_v12 = vadd.f32 %v766_v63, %v765_v59 }
 0x186   :  { %v542_v31 = vmul.f32 %v465_v48, %v422_v4  ;;  %v424_v48 = vld [vmem:[%s1550_s0 + $0x38] sm:$0xff]  ;;  %v593_v4 = vadd.f32 %v592_v0, %v591_v52 }
 0x187   :  { %v554_v44 = vmul.f32 %v1348_v49, %v424_v48 }
 0x188   :  { %v567_v53 = vsel %vm557_vm1, %v542_v31, 0.0  ;;  %v595_v22 = vadd.f32 %v594_v13, %v593_v4  ;;  %v430_v13 = vld [vmem:[%s1551_s1 + $0x18] sm:$0xff] }
 0x189   :  { %v470_v56 = vpop.permute.xlu1 %469  ;;  %v1355_v57 = vpop.permute.xlu0 %697  ;;  %v568_v1 = vadd.f32 %v567_v53, %v566_v58 }
 0x18a   :  { %v543_v41 = vmul.f32 %v470_v56, %v423_v27  ;;  %v739_v56 = vsel %vm557_vm1, %v715_v15, 0.0  ;;  %v727_v2 = vmul.f32 %v1355_v57, %v424_v48  ;;  %v426_v57 = vld [vmem:[%s1550_s0 + $0x48] sm:$0xff] }
 0x18b   :  { %v740_v25 = vadd.f32 %v739_v56, %v738_v55 }
 0x18c   :  { %v569_v61 = vsel %vm557_vm1, %v543_v41, 0.0  ;;  %v768_v17 = vsel %vm557_vm1, %v727_v2, 0.0 }
 0x18d   :  { %v475_v7 = vpop.permute.xlu1 %474  ;;  %v1366_v8 = vpop.permute.xlu0 %529  ;;  %v570_v10 = vadd.f32 %v569_v61, %v568_v1  ;;  %v742_v49 = vadd.f32 %v741_v9, %v740_v25  ;;  %v769_v34 = vadd.f32 %v768_v17, %v767_v12  ;;  %v427_v9 = vld [vmem:[%s1551_s1] sm:$0xff]  ;;  %v429_v12 = vld [vmem:[%s1551_s1 + $0x10] sm:$0xff] }
 0x18e   :  { %v544_v54 = vmul.f32 %v475_v7, %v424_v48  ;;  %v555_v19 = vmul.f32 %v1366_v8, %v425_v42 }
 0x190   :  { %v571_v5 = vsel %vm557_vm1, %v544_v54, 0.0  ;;  %v598_v8 = vsel %vm557_vm1, %v555_v19, 0.0 }
 0x191   :  { %v648_v29 = vpop.permute.xlu1 %647  ;;  %v703_v30 = vpop.permute.xlu0 %702  ;;  %v572_v18 = vadd.f32 %v571_v5, %v570_v10 }
 0x192   :  { %v717_v6 = vmul.f32 %v648_v29, %v424_v48  ;;  %v728_v11 = vmul.f32 %v703_v30, %v425_v42  ;;  %v596_v29 = vsel %vm557_vm1, %v554_v44, 0.0 }
 0x193   :  { %v597_v38 = vadd.f32 %v596_v29, %v595_v22 }
 0x194   :  { %v743_v23 = vsel %vm557_vm1, %v717_v6, 0.0  ;;  %v770_v30 = vsel %vm557_vm1, %v728_v11, 0.0 }
 0x195   :  { %v480_v32 = vpop.permute.xlu1 %479  ;;  %v535_v50 = vpop.permute.xlu0 %534  ;;  %v744_v35 = vadd.f32 %v743_v23, %v742_v49  ;;  %v771_v39 = vadd.f32 %v770_v30, %v769_v34  ;;  %v599_v46 = vadd.f32 %v598_v8, %v597_v38 }
 0x196   :  { %v545_v62 = vmul.f32 %v480_v32, %v425_v42  ;;  %v556_v27 = vmul.f32 %v535_v50, %v426_v57 }
 0x198   :  { %v573_v14 = vsel %vm557_vm1, %v545_v62, 0.0  ;;  %v600_v41 = vsel %vm557_vm1, %v556_v27, 0.0  ;;  %v434_v27 = vld [vmem:[%s1551_s1 + $0x38] sm:$0xff] }
 0x199   :  { %v653_v3 = vpop.permute.xlu1 %652  ;;  %v708_v7 = vpop.permute.xlu0 %707  ;;  %v574_v26 = vadd.f32 %v573_v14, %v572_v18  ;;  %v601_v51 = vadd.f32 %v600_v41, %v599_v46 }
 0x19a   :  { %v718_v16 = vmul.f32 %v653_v3, %v425_v42  ;;  %v729_v20 = vmul.f32 %v708_v7, %v426_v57  ;;  %v428_v7 = vld [vmem:[%s1551_s1 + $0x8] sm:$0xff] }
 0x19b   :  { %v602_v33 = vrot.slane %v601_v51, 4 }
 0x19c   :  { %v745_v28 = vsel %vm557_vm1, %v718_v16, 0.0  ;;  %v772_v36 = vsel %vm557_vm1, %v729_v20, 0.0  ;;  %v431_v20 = vld [vmem:[%s1551_s1 + $0x20] sm:$0xff] }
 0x19d   :  { %v485_v21 = vpop.permute.xlu1 %484  ;;  %v746_v43 = vadd.f32 %v745_v28, %v744_v35  ;;  %v773_v47 = vadd.f32 %v772_v36, %v771_v39  ;;  %v603_v61 = vadd.f32 %v602_v33, %v601_v51 }
 0x19e   :  { %v546_v24 = vmul.f32 %v485_v21, %v426_v57  ;;  %v432_v21 = vld [vmem:[%s1551_s1 + $0x28] sm:$0xff] }
 0x19f   :  { %v774_v54 = vrot.slane %v773_v47, 4  ;;  %v604_v2 = vrot.slane %v603_v61, 2 }
 0x1a0   :  { %v575_v31 = vsel %vm557_vm1, %v546_v24, 0.0 }
 0x1a1   :  { %v576_v15 = vadd.f32 %v575_v31, %v574_v26  ;;  %v658_v37 = vpop.permute.xlu1 %657  ;;  %v775_v59 = vadd.f32 %v774_v54, %v773_v47  ;;  %v605_v6 = vadd.f32 %v604_v2, %v603_v61  ;;  %v433_v26 = vld [vmem:[%s1551_s1 + $0x30] sm:$0xff] }
 0x1a2   :  { %v719_v40 = vmul.f32 %v658_v37, %v426_v57  ;;  %v436_v37 = vld [vmem:[%s1551_s1 + $0x48] sm:$0xff] }
 0x1a3   :  { %v577_v45 = vrot.slane %v576_v15, 4  ;;  %v776_v0 = vrot.slane %v775_v59, 2  ;;  %v606_v18 = vrot.slane %v605_v6, 1 }
 0x1a4   :  { %v747_v48 = vsel %vm557_vm1, %v719_v40, 0.0 }
 0x1a5   :  { %v578_v32 = vadd.f32 %v577_v45, %v576_v15  ;;  %v748_v50 = vadd.f32 %v747_v48, %v746_v43  ;;  %v777_v4 = vadd.f32 %v776_v0, %v775_v59  ;;  %v607_v29 = vadd.f32 %v606_v18, %v605_v6  ;;  %v435_v15 = vld [vmem:[%s1551_s1 + $0x40] sm:$0xff] }
 0x1a7   :  { %v579_v52 = vrot.slane %v578_v32, 2  ;;  %v749_v53 = vrot.slane %v748_v50, 4  ;;  %v778_v11 = vrot.slane %v777_v4, 1  ;;  %v609_v35 = vmax.f32 %v607_v29, 0.0 }
 0x1a9   :  { %v580_v55 = vadd.f32 %v579_v52, %v578_v32  ;;  %v750_v56 = vadd.f32 %v749_v53, %v748_v50  ;;  %v779_v19 = vadd.f32 %v778_v11, %v777_v4 }
 0x1ab   :  { %v581_v58 = vrot.slane %v580_v55, 1  ;;  %v751_v42 = vrot.slane %v750_v56, 2  ;;  %v781_v30 = vmax.f32 %v779_v19, 0.0 }
 0x1ad   :  { %v752_v60 = vadd.f32 %v751_v42, %v750_v56  ;;  %v582_v62 = vadd.f32 %v581_v58, %v580_v55  ;;  %v783_v36 = vadd.f32 %v781_v30, %v609_v35 }
 0x1af   :  { %v753_v63 = vrot.slane %v752_v60, 1  ;;  %v608_v3 = vmax.f32 %v582_v62, 0.0  ;;  %v795_v46 = vmul.f32 %v783_v36, %v428_v7  ;;  %v794_v47 = vmul.f32 %v783_v36, %v427_v9 }
 0x1b0   :  { %v797_v50 = vmul.f32 %v783_v36, %v430_v13  ;;  %v796_v51 = vmul.f32 %v783_v36, %v429_v12  ;;  %v799_v54 = vmul.f32 %v783_v36, %v432_v21  ;;  %v798_v55 = vmul.f32 %v783_v36, %v431_v20 }
 0x1b1   :  { %v754_v1 = vadd.f32 %v753_v63, %v752_v60  ;;  %v837_v48 = vsel %vm557_vm1, %v795_v46, 0.0  ;;  %v834_v32 = vsel %vm557_vm1, %v794_v47, 0.0  ;;  %v801_v58 = vmul.f32 %v783_v36, %v434_v27 }
 0x1b2   :  { %v843_v52 = vsel %vm557_vm1, %v797_v50, 0.0  ;;  %v840_v53 = vsel %vm557_vm1, %v796_v51, 0.0  ;;  %v849_v56 = vsel %vm557_vm1, %v799_v54, 0.0  ;;  %v846_v33 = vsel %vm557_vm1, %v798_v55, 0.0 }
 0x1b3   :  { %v780_v25 = vmax.f32 %v754_v1, 0.0  ;;  %v800_v42 = vmul.f32 %v783_v36, %v433_v26  ;;  %v855_v59 = vsel %vm557_vm1, %v801_v58, 0.0  ;;  %v803_v61 = vmul.f32 %v783_v36, %v436_v37 }
 0x1b4   :  { %v802_v62 = vmul.f32 %v783_v36, %v435_v15 }
 0x1b5   :  { %v782_v5 = vadd.f32 %v780_v25, %v608_v3  ;;  %v852_v60 = vsel %vm557_vm1, %v800_v42, 0.0  ;;  %v861_v63 = vsel %vm557_vm1, %v803_v61, 0.0 }
 0x1b6   :  { %v858_v0 = vsel %vm557_vm1, %v802_v62, 0.0 }
 0x1b7   :  { %v785_v44 = vmul.f32 %v782_v5, %v428_v7  ;;  %v784_v10 = vmul.f32 %v782_v5, %v427_v9  ;;  %v786_v16 = vmul.f32 %v782_v5, %v429_v12  ;;  %v787_v17 = vmul.f32 %v782_v5, %v430_v13 }
 0x1b8   :  { %v788_v23 = vmul.f32 %v782_v5, %v431_v20  ;;  %v789_v24 = vmul.f32 %v782_v5, %v432_v21  ;;  %v790_v31 = vmul.f32 %v782_v5, %v433_v26  ;;  %v791_v8 = vmul.f32 %v782_v5, %v434_v27 }
 0x1b9   :  { %v807_v14 = vsel %vm557_vm1, %v785_v44, 0.0  ;;  %v804_v57 = vsel %vm557_vm1, %v784_v10, 0.0  ;;  %v810_v49 = vsel %vm557_vm1, %v786_v16, 0.0  ;;  %v813_v22 = vsel %vm557_vm1, %v787_v17, 0.0 }
 0x1ba   :  { %808 = vadd.xlane.f32.xlu0 %v807_v14  ;;  %805 = vadd.xlane.f32.xlu1 %v804_v57  ;;  %v816_v34 = vsel %vm557_vm1, %v788_v23, 0.0  ;;  %v819_v28 = vsel %vm557_vm1, %v789_v24, 0.0  ;;  %v822_v38 = vsel %vm557_vm1, %v790_v31, 0.0  ;;  %v825_v39 = vsel %vm557_vm1, %v791_v8, 0.0 }
 0x1bb   :  { %v792_v40 = vmul.f32 %v782_v5, %v435_v15  ;;  %v793_v41 = vmul.f32 %v782_v5, %v436_v37 }
 0x1bd   :  { %v828_v43 = vsel %vm557_vm1, %v792_v40, 0.0  ;;  %v831_v45 = vsel %vm557_vm1, %v793_v41, 0.0 }
 0x1be   :  { %811 = vadd.xlane.f32.xlu0 %v810_v49  ;;  %814 = vadd.xlane.f32.xlu1 %v813_v22 }
 0x1c2   :  { %817 = vadd.xlane.f32.xlu0 %v816_v34  ;;  %820 = vadd.xlane.f32.xlu1 %v819_v28 }
 0x1c6   :  { %823 = vadd.xlane.f32.xlu0 %v822_v38  ;;  %826 = vadd.xlane.f32.xlu1 %v825_v39 }
 0x1ca   :  { %829 = vadd.xlane.f32.xlu0 %v828_v43  ;;  %832 = vadd.xlane.f32.xlu1 %v831_v45 }
 0x1ce   :  { %838 = vadd.xlane.f32.xlu1 %v837_v48  ;;  %835 = vadd.xlane.f32.xlu0 %v834_v32 }
 0x1d2   :  { %844 = vadd.xlane.f32.xlu1 %v843_v52  ;;  %841 = vadd.xlane.f32.xlu0 %v840_v53 }
 0x1d6   :  { %850 = vadd.xlane.f32.xlu1 %v849_v56  ;;  %847 = vadd.xlane.f32.xlu0 %v846_v33 }
 0x1da   :  { %856 = vadd.xlane.f32.xlu1 %v855_v59  ;;  %853 = vadd.xlane.f32.xlu0 %v852_v60 }
 0x1de   :  { %862 = vadd.xlane.f32.xlu1 %v861_v63  ;;  %859 = vadd.xlane.f32.xlu0 %v858_v0 }
 0x247   :  { %v806_v1 = vpop.xlane.xlu1 %805  ;;  %v809_v2 = vpop.xlane.xlu0 %808 }
 0x248   :  { %v1009_v3 = vmul.f32 -1.442695, %v806_v1  ;;  %v1010_v25 = vmul.f32 -1.442695, %v809_v2 }
 0x24a   :  { %1037 = vpow2.f32 %v1009_v3 }
 0x24b   :  { %1039 = vpow2.f32 %v1010_v25  ;;  %v815_v4 = vpop.xlane.xlu1 %814  ;;  %v812_v5 = vpop.xlane.xlu0 %811 }
 0x24c   :  { %v1012_v6 = vmul.f32 -1.442695, %v815_v4  ;;  %v1011_v7 = vmul.f32 -1.442695, %v812_v5 }
 0x24e   :  { %1041 = vpow2.f32 %v1012_v6 }
 0x24f   :  { %1043 = vpow2.f32 %v1011_v7  ;;  %v821_v9 = vpop.xlane.xlu1 %820  ;;  %v818_v44 = vpop.xlane.xlu0 %817 }
 0x250   :  { %v1014_v10 = vmul.f32 -1.442695, %v821_v9  ;;  %v1013_v11 = vmul.f32 -1.442695, %v818_v44 }
 0x252   :  { %1045 = vpow2.f32 %v1014_v10 }
 0x253   :  { %1047 = vpow2.f32 %v1013_v11  ;;  %v827_v12 = vpop.xlane.xlu1 %826  ;;  %v824_v13 = vpop.xlane.xlu0 %823 }
 0x254   :  { %v1038_v14 = vpop.eup %1037  ;;  %v1016_v57 = vmul.f32 -1.442695, %v827_v12  ;;  %v1015_v18 = vmul.f32 -1.442695, %v824_v13 }
 0x255   :  { %v1040_v16 = vpop.eup %1039  ;;  %v924_v17 = vadd.f32 1.0, %v1038_v14 }
 0x256   :  { %v925_v19 = vadd.f32 1.0, %v1040_v16  ;;  %1049 = vpow2.f32 %v1016_v57 }
 0x257   :  { %1051 = vrcp.f32 %v924_v17  ;;  %v833_v20 = vpop.xlane.xlu1 %832  ;;  %v830_v21 = vpop.xlane.xlu0 %829 }
 0x258   :  { %v1042_v49 = vpop.eup %1041  ;;  %1053 = vrcp.f32 %v925_v19  ;;  %v1018_v22 = vmul.f32 -1.442695, %v833_v20  ;;  %v1017_v29 = vmul.f32 -1.442695, %v830_v21 }
 0x259   :  { %v1044_v23 = vpop.eup %1043  ;;  %v927_v24 = vadd.f32 1.0, %v1042_v49  ;;  %1055 = vpow2.f32 %v1015_v18 }
 0x25a   :  { %v926_v30 = vadd.f32 1.0, %v1044_v23  ;;  %1057 = vpow2.f32 %v1018_v22 }
 0x25b   :  { %1059 = vrcp.f32 %v927_v24  ;;  %v839_v26 = vpop.xlane.xlu1 %838  ;;  %v836_v27 = vpop.xlane.xlu0 %835 }
 0x25c   :  { %v1046_v34 = vpop.eup %1045  ;;  %1061 = vrcp.f32 %v926_v30  ;;  %v1020_v28 = vmul.f32 -1.442695, %v839_v26  ;;  %v1019_v35 = vmul.f32 -1.442695, %v836_v27 }
 0x25d   :  { %v1048_v31 = vpop.eup %1047  ;;  %v929_v8 = vadd.f32 1.0, %v1046_v34  ;;  %1063 = vpow2.f32 %v1017_v29 }
 0x25e   :  { %v928_v36 = vadd.f32 1.0, %v1048_v31  ;;  %1065 = vpow2.f32 %v1020_v28 }
 0x25f   :  { %1067 = vrcp.f32 %v929_v8  ;;  %v845_v15 = vpop.xlane.xlu1 %844  ;;  %v842_v37 = vpop.xlane.xlu0 %841 }
 0x260   :  { %v1050_v38 = vpop.eup %1049  ;;  %1069 = vrcp.f32 %v928_v36  ;;  %v1022_v39 = vmul.f32 -1.442695, %v845_v15  ;;  %v1021_v40 = vmul.f32 -1.442695, %v842_v37 }
 0x261   :  { %v1052_v41 = vpop.eup %1051  ;;  %v931_v43 = vadd.f32 1.0, %v1050_v38  ;;  %1071 = vpow2.f32 %v1019_v35 }
 0x262   :  { %v1054_v45 = vpop.eup %1053  ;;  %984 = vst.msk [vmem:[%s1553_s3] sm:$0xff] %vm32_vm0, %v1052_v41  ;;  %1073 = vpow2.f32 %v1022_v39 }
 0x263   :  { %v1056_v46 = vpop.eup %1055  ;;  %985 = vst.msk [vmem:[%s1553_s3 + $0x8] sm:$0xff] %vm32_vm0, %v1054_v45  ;;  %1075 = vrcp.f32 %v931_v43  ;;  %v851_v47 = vpop.xlane.xlu1 %850 }
 0x264   :  { %v848_v48 = vpop.xlane.xlu0 %847  ;;  %v1058_v32 = vpop.eup %1057  ;;  %v930_v50 = vadd.f32 1.0, %v1056_v46  ;;  %1077 = vpow2.f32 %v1021_v40  ;;  %v1024_v51 = vmul.f32 -1.442695, %v851_v47 }
 0x265   :  { %v1060_v52 = vpop.eup %1059  ;;  %v933_v53 = vadd.f32 1.0, %v1058_v32  ;;  %v1023_v54 = vmul.f32 -1.442695, %v848_v48 }
 0x266   :  { %v1062_v55 = vpop.eup %1061  ;;  %987 = vst.msk [vmem:[%s1553_s3 + $0x18] sm:$0xff] %vm32_vm0, %v1060_v52  ;;  %1079 = vrcp.f32 %v930_v50 }
 0x267   :  { %v1064_v56 = vpop.eup %1063  ;;  %986 = vst.msk [vmem:[%s1553_s3 + $0x10] sm:$0xff] %vm32_vm0, %v1062_v55  ;;  %1081 = vrcp.f32 %v933_v53  ;;  %v857_v33 = vpop.xlane.xlu1 %856 }
 0x268   :  { %v854_v58 = vpop.xlane.xlu0 %853  ;;  %v1066_v42 = vpop.eup %1065  ;;  %v932_v59 = vadd.f32 1.0, %v1064_v56  ;;  %1083 = vpow2.f32 %v1024_v51  ;;  %v1026_v60 = vmul.f32 -1.442695, %v857_v33 }
 0x269   :  { %v1068_v61 = vpop.eup %1067  ;;  %v935_v62 = vadd.f32 1.0, %v1066_v42  ;;  %1085 = vpow2.f32 %v1023_v54  ;;  %v1025_v63 = vmul.f32 -1.442695, %v854_v58 }
 0x26a   :  { %v1070_v0 = vpop.eup %1069  ;;  %989 = vst.msk [vmem:[%s1553_s3 + $0x28] sm:$0xff] %vm32_vm0, %v1068_v61  ;;  %1087 = vrcp.f32 %v932_v59 }
 0x26b   :  { %v1072_v1 = vpop.eup %1071  ;;  %988 = vst.msk [vmem:[%s1553_s3 + $0x20] sm:$0xff] %vm32_vm0, %v1070_v0  ;;  %1089 = vrcp.f32 %v935_v62  ;;  %v863_v2 = vpop.xlane.xlu1 %862 }
 0x26c   :  { %v860_v3 = vpop.xlane.xlu0 %859  ;;  %v1074_v25 = vpop.eup %1073  ;;  %v934_v4 = vadd.f32 1.0, %v1072_v1  ;;  %1091 = vpow2.f32 %v1026_v60  ;;  %v1028_v5 = vmul.f32 -1.442695, %v863_v2 }
 0x26d   :  { %v1076_v6 = vpop.eup %1075  ;;  %v937_v7 = vadd.f32 1.0, %v1074_v25  ;;  %1093 = vpow2.f32 %v1025_v63  ;;  %v1027_v44 = vmul.f32 -1.442695, %v860_v3 }
 0x26e   :  { %v1078_v9 = vpop.eup %1077  ;;  %991 = vst.msk [vmem:[%s1553_s3 + $0x38] sm:$0xff] %vm32_vm0, %v1076_v6  ;;  %1095 = vrcp.f32 %v934_v4 }
 0x26f   :  { %1097 = vrcp.f32 %v937_v7  ;;  %v936_v10 = vadd.f32 1.0, %v1078_v9 }
 0x270   :  { %v1080_v11 = vpop.eup %1079  ;;  %1099 = vpow2.f32 %v1028_v5 }
 0x271   :  { %v1082_v12 = vpop.eup %1081  ;;  %990 = vst.msk [vmem:[%s1553_s3 + $0x30] sm:$0xff] %vm32_vm0, %v1080_v11  ;;  %1101 = vrcp.f32 %v936_v10 }
 0x272   :  { %v1084_v13 = vpop.eup %1083  ;;  %993 = vst.msk [vmem:[%s1553_s3 + $0x48] sm:$0xff] %vm32_vm0, %v1082_v12  ;;  %1103 = vpow2.f32 %v1027_v44 }
 0x273   :  { %v1086_v14 = vpop.eup %1085  ;;  %v939_v57 = vadd.f32 1.0, %v1084_v13 }
 0x274   :  { %v1088_v16 = vpop.eup %1087  ;;  %v938_v17 = vadd.f32 1.0, %v1086_v14 }
 0x275   :  { %v1090_v18 = vpop.eup %1089  ;;  %992 = vst.msk [vmem:[%s1553_s3 + $0x40] sm:$0xff] %vm32_vm0, %v1088_v16  ;;  %1105 = vrcp.f32 %v939_v57 }
 0x276   :  { %v1092_v19 = vpop.eup %1091  ;;  %995 = vst.msk [vmem:[%s1553_s3 + $0x58] sm:$0xff] %vm32_vm0, %v1090_v18  ;;  %1107 = vrcp.f32 %v938_v17 }
 0x277   :  { %v1094_v20 = vpop.eup %1093  ;;  %v941_v21 = vadd.f32 1.0, %v1092_v19 }
 0x278   :  { %v1096_v49 = vpop.eup %1095  ;;  %v940_v22 = vadd.f32 1.0, %v1094_v20 }
 0x279   :  { %v1098_v23 = vpop.eup %1097  ;;  %994 = vst.msk [vmem:[%s1553_s3 + $0x50] sm:$0xff] %vm32_vm0, %v1096_v49  ;;  %1109 = vrcp.f32 %v941_v21 }
 0x27a   :  { %v1100_v24 = vpop.eup %1099  ;;  %997 = vst.msk [vmem:[%s1553_s3 + $0x68] sm:$0xff] %vm32_vm0, %v1098_v23  ;;  %1111 = vrcp.f32 %v940_v22 }
 0x27b   :  { %v1102_v29 = vpop.eup %1101  ;;  %v943_v30 = vadd.f32 1.0, %v1100_v24 }
 0x27c   :  { %v1104_v26 = vpop.eup %1103  ;;  %996 = vst.msk [vmem:[%s1553_s3 + $0x60] sm:$0xff] %vm32_vm0, %v1102_v29 }
 0x27d   :  { %1113 = vrcp.f32 %v943_v30  ;;  %v942_v27 = vadd.f32 1.0, %v1104_v26 }
 0x27f   :  { %v1106_v34 = vpop.eup %1105  ;;  %1115 = vrcp.f32 %v942_v27 }
 0x280   :  { %v1108_v28 = vpop.eup %1107  ;;  %999 = vst.msk [vmem:[%s1553_s3 + $0x78] sm:$0xff] %vm32_vm0, %v1106_v34 }
 0x281   :  { %998 = vst.msk [vmem:[%s1553_s3 + $0x70] sm:$0xff] %vm32_vm0, %v1108_v28 }
 0x283   :  { %v1110_v31 = vpop.eup %1109 }
 0x284   :  { %v1112_v8 = vpop.eup %1111  ;;  %1001 = vst.msk [vmem:[%s1553_s3 + $0x88] sm:$0xff] %vm32_vm0, %v1110_v31 }
 0x285   :  { %1000 = vst.msk [vmem:[%s1553_s3 + $0x80] sm:$0xff] %vm32_vm0, %v1112_v8 }
 0x287   :  { %v1114_v35 = vpop.eup %1113 }
 0x288   :  { %1003 = vst.msk [vmem:[%s1553_s3 + $0x98] sm:$0xff] %vm32_vm0, %v1114_v35 }
 0x289   :  { %v1116_v36 = vpop.eup %1115 }
 0x28a   :  { %1002 = vst.msk [vmem:[%s1553_s3 + $0x90] sm:$0xff] %vm32_vm0, %v1116_v36 }
 0x28b   :  { %1008 = vsyncpa [#allocation5], 1 }

</bundles_post_ra>
